<compile_context>
chip_gen: v7x
topology: tpu7x:2x2x1
jax: 0.10.0
libtpu: 0.0.40
codegen_flags: <defaults>
</compile_context>

<pallas_src>
import numpy as np

import jax
import jax.numpy as jnp
from jax import lax
from jax.experimental import pallas as pl
from jax.experimental.pallas import tpu as pltpu

POOL1_K, POOL1_S = 11, 3
H_IN = W_IN = 32
H_P1 = (H_IN - POOL1_K) // POOL1_S + 1  # 8
W_P1 = (W_IN - POOL1_K) // POOL1_S + 1  # 8
N_POOL = H_P1 * W_P1                    # 64 pooled spatial positions
BN_EPS = 1e-5


def _pool_matrix_np():
    """Constant 0/1 window-sum matrix for AvgPool2d(11, stride=3) on 32x32.

    POOL[h*32 + w, i*8 + j] = 1 iff pixel (h, w) lies in output window (i, j).
    padding=0, so every window has exactly 11*11 valid pixels
    (count_include_pad is irrelevant). The 1/121 scale is folded into w1.
    """
    P = np.zeros((H_IN * W_IN, N_POOL), np.float32)
    for i in range(H_P1):
        for j in range(W_P1):
            for dh in range(POOL1_K):
                for dw in range(POOL1_K):
                    P[(POOL1_S * i + dh) * W_IN + (POOL1_S * j + dw),
                      i * W_P1 + j] = 1.0
    return P


_POOL_NP = _pool_matrix_np()


def _aux_head_kernel(x_ref, pool_ref, w1_ref, b1_ref, w2_ref, b2_ref,
                     w3_ref, b3_ref, out_ref):
    # x_ref: [B*C, 1024] -- B samples, all channels, flattened 32x32 spatial.
    b = out_ref.shape[0]
    c = x_ref.shape[0] // b
    s = pool_ref.shape[1]                                      # 64
    d1 = w1_ref.shape[1]                                       # 128

    x = jnp.maximum(x_ref[...], 0.0)                           # ReLU

    # AvgPool2d(11, stride=3): one MXU matmul with the constant window matrix
    # (sum form; the 1/121 average is folded into w1).
    pooled = jnp.dot(x, pool_ref[...],
                     preferred_element_type=jnp.float32)       # [B*C, 64]

    # Move channels to lanes for the 1x1 convolutions (tiny tensor: B*C*64).
    feat = jnp.swapaxes(pooled.reshape(b, c, s), 1, 2)         # [B, 64, C]
    feat = feat.reshape(b * s, c)                              # [B*64, C]

    # Conv2d(C, 128, 1, bias=False) + folded BN + ReLU.
    h1 = jnp.dot(feat, w1_ref[...], preferred_element_type=jnp.float32)
    h1 = jnp.maximum(h1 + b1_ref[...], 0.0)                    # [B*64, 128]

    # AvgPool2d(8) on the 8x8 map == global mean over 64 positions
    # (the 1/64 is folded into w2, so a plain sum here).
    g = jnp.sum(h1.reshape(b, s, d1), axis=1)                  # [B, 128]

    # Conv2d(128, 768, 1, bias=False) + folded BN + ReLU.
    h2 = jnp.dot(g, w2_ref[...], preferred_element_type=jnp.float32)
    h2 = jnp.maximum(h2 + b2_ref[...], 0.0)                    # [B, 768]

    # Dropout(p=0) is identity; Linear(768, num_classes) (lane-padded).
    logits = jnp.dot(h2, w3_ref[...], preferred_element_type=jnp.float32)
    out_ref[...] = (logits + b3_ref[...]).astype(out_ref.dtype)


def _pick_batch_block(n, c):
    """Samples per grid step.

    Keeps the input block <= ~4 MiB so the double-buffered pipeline fits
    comfortably within v7x's smaller VMEM (64 MiB phys / 32 MiB scoped
    default), and satisfies the (8,128) sublane rule (B % 8 == 0 or B == N).
    """
    cap = max(1, min(n, 1024 // max(c, 1), 128))
    if n <= cap:
        return n
    start = cap - cap % 8
    for b in range(start, 0, -8):
        if n % b == 0:
            return b
    return n  # fallback: single block over the whole batch


def aux_head_forward(x_nchw, params):
    """x_nchw: [N, C, 32, 32] float32 (PyTorch layout). Returns [N, num_classes]."""
    w1, s1, b1, w2, s2, b2, w3, b3 = params
    n, c, h, w = x_nchw.shape
    assert (h, w) == (H_IN, W_IN), "module assumes 32x32 input"
    num_classes = w3.shape[1]
    ncp = max(128, -(-num_classes // 128) * 128)   # lane-dense padded classes

    # ---- host-side constant folding (pool scales + BN scales into convs) ----
    pool = jnp.asarray(_POOL_NP)                                 # [1024, 64]
    w1f = w1 * (s1 / float(POOL1_K * POOL1_K))                   # [C, 128]
    b1f = b1                                                     # [1, 128]
    w2f = w2 * (s2 / float(N_POOL))                              # [128, 768]
    b2f = b2                                                     # [1, 768]
    w3p = jnp.pad(w3, ((0, 0), (0, ncp - num_classes)))          # [768, NCP]
    b3p = jnp.pad(b3, ((0, 0), (0, ncp - num_classes)))          # [1, NCP]

    # Free row-major reshape: NCHW [N,C,32,32] -> [N*C, 1024]. No transpose,
    # no extra HBM traffic.
    x2 = x_nchw.reshape(n * c, H_IN * W_IN)

    bb = _pick_batch_block(n, c)
    grid = (n // bb,)

    def _const_spec(a):
        nd = a.ndim
        return pl.BlockSpec(a.shape, lambda i, _nd=nd: (0,) * _nd)

    flops = 2 * n * (c * H_IN * W_IN * N_POOL          # pooling matmul
                     + N_POOL * c * 128                # conv1 (1x1)
                     + 128 * 768                       # conv2 (1x1)
                     + 768 * ncp)                      # classifier
    bytes_accessed = 4 * (x2.size + pool.size + w1f.size + b1f.size
                          + w2f.size + b2f.size + w3p.size + b3p.size
                          + n * ncp)

    out = pl.pallas_call(
        _aux_head_kernel,
        out_shape=jax.ShapeDtypeStruct((n, ncp), jnp.float32),
        grid=grid,
        in_specs=[
            pl.BlockSpec((bb * c, H_IN * W_IN), lambda i: (i, 0)),
            _const_spec(pool),
            _const_spec(w1f), _const_spec(b1f),
            _const_spec(w2f), _const_spec(b2f),
            _const_spec(w3p), _const_spec(b3p),
        ],
        out_specs=pl.BlockSpec((bb, ncp), lambda i: (i, 0)),
        compiler_params=pltpu.CompilerParams(
            dimension_semantics=("parallel",)),
        cost_estimate=pl.CostEstimate(flops=flops, transcendentals=0,
                                      bytes_accessed=bytes_accessed),
    )(x2, pool, w1f, b1f, w2f, b2f, w3p, b3p)

    return out[:, :num_classes]


def make_params(C, num_classes, key):
    ks = jax.random.split(key, 12)

    def bn_fold(kg, kb, km, kv, nch):
        gamma = 1.0 + 0.1 * jax.random.normal(kg, (nch,), jnp.float32)
        beta = 0.1 * jax.random.normal(kb, (nch,), jnp.float32)
        mean = 0.1 * jax.random.normal(km, (nch,), jnp.float32)
        var = jax.random.uniform(kv, (nch,), jnp.float32, 0.5, 1.5)
        scale = gamma * lax.rsqrt(var + BN_EPS)
        bias = beta - mean * scale
        return scale.reshape(1, nch), bias.reshape(1, nch)

    w1 = 0.1 * jax.random.normal(ks[0], (C, 128), jnp.float32)
    s1, b1 = bn_fold(ks[1], ks[2], ks[3], ks[4], 128)
    w2 = 0.05 * jax.random.normal(ks[5], (128, 768), jnp.float32)
    s2, b2 = bn_fold(ks[6], ks[7], ks[8], ks[9], 768)
    w3 = 0.05 * jax.random.normal(ks[10], (768, num_classes), jnp.float32)
    b3 = 0.1 * jax.random.normal(ks[11], (1, num_classes), jnp.float32)
    return (w1, s1, b1, w2, s2, b2, w3, b3)


def reference(x_nchw, params):
    """Pure-JAX reference (same folded-BN inference semantics)."""
    w1, s1, b1, w2, s2, b2, w3, b3 = params
    x = jnp.transpose(x_nchw, (0, 2, 3, 1))
    x = jnp.maximum(x, 0.0)
    x = lax.reduce_window(x, 0.0, lax.add,
                          (1, POOL1_K, POOL1_K, 1),
                          (1, POOL1_S, POOL1_S, 1),
                          "VALID") / float(POOL1_K * POOL1_K)
    h = jnp.einsum("nhwc,cd->nhwd", x, w1)
    h = jnp.maximum(h * s1 + b1, 0.0)
    g = jnp.mean(h, axis=(1, 2))                       # [N, 128]
    h2 = jnp.maximum(g @ w2 * s2 + b2, 0.0)            # [N, 768]
    return h2 @ w3 + b3


if __name__ == "__main__":
    N, C, NUM_CLASSES = 8, 4, 10
    key = jax.random.PRNGKey(0)
    kx, kp = jax.random.split(key)
    x = jax.random.normal(kx, (N, C, H_IN, W_IN), jnp.float32)
    params = make_params(C, NUM_CLASSES, kp)

    out = jax.block_until_ready(aux_head_forward(x, params))
    ref = reference(x, params)

    assert out.shape == (N, NUM_CLASSES)
    assert jnp.allclose(out, ref, rtol=1e-3, atol=1e-3), (out, ref)
    print("KERNEL_OK")
</pallas_src>

<mosaic_0001>
module attributes {stable_mosaic.version = 11 : i64} {
  func.func @_aux_head_kernel(%arg0: i32, %arg1: memref<32x1024xf32, #tpu.memory_space<vmem>>, %arg2: memref<1024x64xf32, #tpu.memory_space<vmem>>, %arg3: memref<4x128xf32, #tpu.memory_space<vmem>>, %arg4: memref<1x128xf32, #tpu.memory_space<vmem>>, %arg5: memref<128x768xf32, #tpu.memory_space<vmem>>, %arg6: memref<1x768xf32, #tpu.memory_space<vmem>>, %arg7: memref<768x128xf32, #tpu.memory_space<vmem>>, %arg8: memref<1x128xf32, #tpu.memory_space<vmem>>, %arg9: memref<8x128xf32, #tpu.memory_space<vmem>>) attributes {dimension_semantics = [#tpu.dimension_semantics<parallel>], iteration_bounds = array<i64: 1>, scalar_prefetch = 0 : i64, scratch_operands = 0 : i64, tpu.core_type = #tpu.core_type<tc>, window_params = [{transform_indices = @transform_0, window_bounds = array<i64: 32, 1024>}, {pipeline_mode = #tpu.pipeline_mode<synchronous>, transform_indices = @transform_1, window_bounds = array<i64: 1024, 64>}, {pipeline_mode = #tpu.pipeline_mode<synchronous>, transform_indices = @transform_2, window_bounds = array<i64: 4, 128>}, {pipeline_mode = #tpu.pipeline_mode<synchronous>, transform_indices = @transform_3, window_bounds = array<i64: 1, 128>}, {pipeline_mode = #tpu.pipeline_mode<synchronous>, transform_indices = @transform_4, window_bounds = array<i64: 128, 768>}, {pipeline_mode = #tpu.pipeline_mode<synchronous>, transform_indices = @transform_5, window_bounds = array<i64: 1, 768>}, {pipeline_mode = #tpu.pipeline_mode<synchronous>, transform_indices = @transform_6, window_bounds = array<i64: 768, 128>}, {pipeline_mode = #tpu.pipeline_mode<synchronous>, transform_indices = @transform_7, window_bounds = array<i64: 1, 128>}, {transform_indices = @transform_8, window_bounds = array<i64: 8, 128>}]} {
    %c0 = arith.constant 0 : index
    %c0_0 = arith.constant 0 : index
    %0 = vector.load %arg1[%c0, %c0_0] : memref<32x1024xf32, #tpu.memory_space<vmem>>, vector<32x1024xf32>
    %cst = arith.constant 0.000000e+00 : f32
    %1 = vector.broadcast %cst : f32 to vector<32x1024xf32>
    %2 = arith.maximumf %0, %1 : vector<32x1024xf32>
    %c0_1 = arith.constant 0 : index
    %c0_2 = arith.constant 0 : index
    %3 = vector.load %arg2[%c0_1, %c0_2] : memref<1024x64xf32, #tpu.memory_space<vmem>>, vector<1024x64xf32>
    %cst_3 = arith.constant dense<0.000000e+00> : vector<32x64xf32>
    %4 = tpu.matmul %2, %3, %cst_3 {dimension_numbers = #tpu.dot_dimension_numbers<[1], [0], [0], [1], [0, 0, 1, 1], [], []>} : vector<32x1024xf32>, vector<1024x64xf32>, vector<32x64xf32> -> vector<32x64xf32>
    %5 = vector.shape_cast %4 : vector<32x64xf32> to vector<8x4x64xf32>
    %6 = tpu.transpose %5, [0, 2, 1] : vector<8x4x64xf32> -> vector<8x64x4xf32>
    %7 = vector.shape_cast %6 : vector<8x64x4xf32> to vector<512x4xf32>
    %c0_4 = arith.constant 0 : index
    %c0_5 = arith.constant 0 : index
    %8 = vector.load %arg3[%c0_4, %c0_5] : memref<4x128xf32, #tpu.memory_space<vmem>>, vector<4x128xf32>
    %cst_6 = arith.constant dense<0.000000e+00> : vector<512x128xf32>
    %9 = tpu.matmul %7, %8, %cst_6 {dimension_numbers = #tpu.dot_dimension_numbers<[1], [0], [0], [1], [0, 0, 1, 1], [], []>} : vector<512x4xf32>, vector<4x128xf32>, vector<512x128xf32> -> vector<512x128xf32>
    %c0_7 = arith.constant 0 : index
    %c0_8 = arith.constant 0 : index
    %10 = vector.load %arg4[%c0_7, %c0_8] : memref<1x128xf32, #tpu.memory_space<vmem>>, vector<1x128xf32>
    %11 = vector.broadcast %10 : vector<1x128xf32> to vector<512x128xf32>
    %12 = arith.addf %9, %11 : vector<512x128xf32>
    %cst_9 = arith.constant 0.000000e+00 : f32
    %13 = vector.broadcast %cst_9 : f32 to vector<512x128xf32>
    %14 = arith.maximumf %12, %13 : vector<512x128xf32>
    %15 = vector.shape_cast %14 : vector<512x128xf32> to vector<8x64x128xf32>
    %cst_10 = arith.constant dense<0.000000e+00> : vector<8x128xf32>
    %16 = vector.multi_reduction <add>, %15, %cst_10 [1] : vector<8x64x128xf32> to vector<8x128xf32>
    %c0_11 = arith.constant 0 : index
    %c0_12 = arith.constant 0 : index
    %17 = vector.load %arg5[%c0_11, %c0_12] : memref<128x768xf32, #tpu.memory_space<vmem>>, vector<128x768xf32>
    %cst_13 = arith.constant dense<0.000000e+00> : vector<8x768xf32>
    %18 = tpu.matmul %16, %17, %cst_13 {dimension_numbers = #tpu.dot_dimension_numbers<[1], [0], [0], [1], [0, 0, 1, 1], [], []>} : vector<8x128xf32>, vector<128x768xf32>, vector<8x768xf32> -> vector<8x768xf32>
    %c0_14 = arith.constant 0 : index
    %c0_15 = arith.constant 0 : index
    %19 = vector.load %arg6[%c0_14, %c0_15] : memref<1x768xf32, #tpu.memory_space<vmem>>, vector<1x768xf32>
    %20 = vector.broadcast %19 : vector<1x768xf32> to vector<8x768xf32>
    %21 = arith.addf %18, %20 : vector<8x768xf32>
    %cst_16 = arith.constant 0.000000e+00 : f32
    %22 = vector.broadcast %cst_16 : f32 to vector<8x768xf32>
    %23 = arith.maximumf %21, %22 : vector<8x768xf32>
    %c0_17 = arith.constant 0 : index
    %c0_18 = arith.constant 0 : index
    %24 = vector.load %arg7[%c0_17, %c0_18] : memref<768x128xf32, #tpu.memory_space<vmem>>, vector<768x128xf32>
    %cst_19 = arith.constant dense<0.000000e+00> : vector<8x128xf32>
    %25 = tpu.matmul %23, %24, %cst_19 {dimension_numbers = #tpu.dot_dimension_numbers<[1], [0], [0], [1], [0, 0, 1, 1], [], []>} : vector<8x768xf32>, vector<768x128xf32>, vector<8x128xf32> -> vector<8x128xf32>
    %c0_20 = arith.constant 0 : index
    %c0_21 = arith.constant 0 : index
    %26 = vector.load %arg8[%c0_20, %c0_21] : memref<1x128xf32, #tpu.memory_space<vmem>>, vector<1x128xf32>
    %27 = vector.broadcast %26 : vector<1x128xf32> to vector<8x128xf32>
    %28 = arith.addf %25, %27 : vector<8x128xf32>
    %c0_22 = arith.constant 0 : index
    %c0_23 = arith.constant 0 : index
    %29 = vector.load %arg9[%c0_22, %c0_23] : memref<8x128xf32, #tpu.memory_space<vmem>>, vector<8x128xf32>
    tpu.vector_store %arg9[%c0_22, %c0_23], %28 {strides = array<i32>} : memref<8x128xf32, #tpu.memory_space<vmem>>, vector<8x128xf32>,
    return
  }
  func.func @transform_0(%arg0: i32) -> (i32, i32) {
    %c0_i32 = arith.constant 0 : i32
    %c0_i32_0 = arith.constant 0 : i32
    return %arg0, %c0_i32 : i32, i32
  }
  func.func @transform_1(%arg0: i32) -> (i32, i32) {
    %c0_i32 = arith.constant 0 : i32
    %c0_i32_0 = arith.constant 0 : i32
    %c0_i32_1 = arith.constant 0 : i32
    return %c0_i32, %c0_i32_0 : i32, i32
  }
  func.func @transform_2(%arg0: i32) -> (i32, i32) {
    %c0_i32 = arith.constant 0 : i32
    %c0_i32_0 = arith.constant 0 : i32
    %c0_i32_1 = arith.constant 0 : i32
    return %c0_i32, %c0_i32_0 : i32, i32
  }
  func.func @transform_3(%arg0: i32) -> (i32, i32) {
    %c0_i32 = arith.constant 0 : i32
    %c0_i32_0 = arith.constant 0 : i32
    %c0_i32_1 = arith.constant 0 : i32
    return %c0_i32, %c0_i32_0 : i32, i32
  }
  func.func @transform_4(%arg0: i32) -> (i32, i32) {
    %c0_i32 = arith.constant 0 : i32
    %c0_i32_0 = arith.constant 0 : i32
    %c0_i32_1 = arith.constant 0 : i32
    return %c0_i32, %c0_i32_0 : i32, i32
  }
  func.func @transform_5(%arg0: i32) -> (i32, i32) {
    %c0_i32 = arith.constant 0 : i32
    %c0_i32_0 = arith.constant 0 : i32
    %c0_i32_1 = arith.constant 0 : i32
    return %c0_i32, %c0_i32_0 : i32, i32
  }
  func.func @transform_6(%arg0: i32) -> (i32, i32) {
    %c0_i32 = arith.constant 0 : i32
    %c0_i32_0 = arith.constant 0 : i32
    %c0_i32_1 = arith.constant 0 : i32
    return %c0_i32, %c0_i32_0 : i32, i32
  }
  func.func @transform_7(%arg0: i32) -> (i32, i32) {
    %c0_i32 = arith.constant 0 : i32
    %c0_i32_0 = arith.constant 0 : i32
    %c0_i32_1 = arith.constant 0 : i32
    return %c0_i32, %c0_i32_0 : i32, i32
  }
  func.func @transform_8(%arg0: i32) -> (i32, i32) {
    %c0_i32 = arith.constant 0 : i32
    %c0_i32_0 = arith.constant 0 : i32
    return %arg0, %c0_i32 : i32, i32
  }
}

</mosaic_0001>

<bundles_post_ra>
// kernel: tpu_custom_call.1
= control target key start
LH: loop header
LB: loop body
LE: loop exit
PB: predicated region body
PF: predicated region fallthrough
CT: control target
= control target key end

     0   :  { %13 = vsyncpa [#allocation3], 0  ;;  %s4487_s0 = inlined_call_operand.hbm [shape: f32[32,1024], index: 0, kind: input, shape index: {}]   ;;  %s4488_s1 = inlined_call_operand.vmem [shape: f32[1024,64], index: 1, kind: input, shape index: {}]   ;;  %s4489_s2 = inlined_call_operand.hbm [shape: f32[4,128], index: 2, kind: input, shape index: {}]   ;;  %s4490_s3 = inlined_call_operand.hbm [shape: f32[1,128], index: 3, kind: input, shape index: {}]   ;;  %s4491_s4 = inlined_call_operand.vmem [shape: f32[128,768], index: 4, kind: input, shape index: {}]   ;;  %s4492_s5 = inlined_call_operand.vmem [shape: f32[1,768], index: 5, kind: input, shape index: {}]   ;;  %s4493_s6 = inlined_call_operand.vmem [shape: f32[768,128], index: 6, kind: input, shape index: {}]   ;;  %s4494_s7 = inlined_call_operand.vmem [shape: f32[1,128], index: 7, kind: input, shape index: {}]   ;;  %s4495_s8 = inlined_call_operand.hbm [shape: f32[8,128], index: 8, kind: output, shape index: {}]  }
   0x1   :  { %14 = vsyncpa [#allocation6], 0 }
   0x2   :  { %15 = vsyncpa [#allocation4], 0  ;;  %s3257_s27 = smov [#allocation5]   ;;  %s3258_s29 = smov [#allocation2]  }
   0x3   :  { %s36_s28 = sshll.u32 %s3257_s27, 4  ;;  %s21_s30 = sshll.u32 %s3258_s29, 4  ;;  %s37_s28 = int_to_ptr.vmem [resolvable:$true] %s36_s28  ;;  %s3309_s30 = int_to_ptr.vmem [resolvable:$true] %s21_s30 }
   0x4   :  { %s3163_s11 = scalar_lea.hbm %s4489_s2, 64 }
   0x5   :  { %p3164_p0 = scmp.ne.s32.totalorder %s4489_s2, %s3163_s11  ;;  %p3167_p1 = scmp.lt.u32.totalorder %s3163_s11, %s4489_s2 }
   0x7   :  { %p3169_p2 = pnand %p3167_p1, %p3164_p0 }
   0x9   :  { %3172 = shalt.err (!%p3169_p2)
}
   0xa   :  { %s3173_s16 = scalar_lea.vmem %s37_s28, 64  ;;  %p3178_p4 = scmp.lt.s32.totalorder %s37_s28, %s37_s28 }
   0xb   :  { %p3174_p3 = scmp.ne.s32.totalorder %s37_s28, %s3173_s16  ;;  %p3179_p5 = scmp.lt.s32.totalorder %s3173_s16, %s3173_s16 }
   0xd   :  { %p3180_p6 = por %p3179_p5, %p3178_p4 }
   0xf   :  { %p3181_p7 = pnand %p3180_p6, %p3174_p3 }
  0x11   :  { %3184 = shalt.err (!%p3181_p7)
}
  0x12   :  { %39 = dma.hbm_to_vmem [thread:$0]  %s4489_s2, 64, %s37_s28, [#allocation6]  }
  0x13   :  { %s3185_s21 = scalar_lea.hbm %s4487_s0, 4096 }
  0x14   :  { %p3186_p8 = scmp.ne.s32.totalorder %s4487_s0, %s3185_s21  ;;  %p3189_p9 = scmp.lt.u32.totalorder %s3185_s21, %s4487_s0 }
  0x16   :  { %p3191_p10 = pnand %p3189_p9, %p3186_p8 }
  0x18   :  { %3194 = shalt.err (!%p3191_p10)
}
  0x19   :  { %s3195_s26 = scalar_lea.vmem %s3309_s30, 4096  ;;  %p3200_p12 = scmp.lt.s32.totalorder %s3309_s30, %s3309_s30 }
  0x1a   :  { %p3196_p11 = scmp.ne.s32.totalorder %s3309_s30, %s3195_s26  ;;  %p3201_p13 = scmp.lt.s32.totalorder %s3195_s26, %s3195_s26 }
  0x1c   :  { %p3202_p0 = por %p3201_p13, %p3200_p12 }
  0x1e   :  { %p3203_p1 = pnand %p3202_p0, %p3196_p11 }
  0x20   :  { %3206 = shalt.err (!%p3203_p1)
}
  0x21   :  { %s3259_s2 = smov 1024   ;;  %s3260_s27 = smov 64  }
  0x22   :  { %27 = dma.hbm_to_vmem [thread:$0]  %s4487_s0, 4096, %s3309_s30, [#allocation3], %s3259_s2, %s3259_s2, %s3260_s27  }
  0x23   :  { %s3261_s9 = smov [#allocation7]   ;;  %s3207_s13 = scalar_lea.hbm %s4490_s3, 16 }
  0x24   :  { %s46_s10 = sshll.u32 %s3261_s9, 4  ;;  %p3208_p2 = scmp.ne.s32.totalorder %s4490_s3, %s3207_s13  ;;  %s47_s10 = int_to_ptr.vmem [resolvable:$true] %s46_s10 }
  0x25   :  { %p3211_p3 = scmp.lt.u32.totalorder %s3207_s13, %s4490_s3 }
  0x27   :  { %p3213_p4 = pnand %p3211_p3, %p3208_p2 }
  0x29   :  { %3216 = shalt.err (!%p3213_p4)
}
  0x2a   :  { %s3217_s18 = scalar_lea.vmem %s47_s10, 16  ;;  %s3221_s0 = scalar_lea.vmem %s47_s10, 32 }
  0x2b   :  { %p3218_p5 = scmp.ne.s32.totalorder %s47_s10, %s3217_s18  ;;  %p3222_p6 = scmp.lt.s32.totalorder %s47_s10, %s47_s10 }
  0x2c   :  { %p3223_p7 = scmp.lt.s32.totalorder %s3221_s0, %s3217_s18 }
  0x2e   :  { %p3224_p8 = por %p3223_p7, %p3222_p6 }
  0x30   :  { %p3225_p9 = pnand %p3224_p8, %p3218_p5 }
  0x32   :  { %3228 = shalt.err (!%p3225_p9)
}
  0x33   :  { %49 = dma.hbm_to_vmem [thread:$0]  %s4490_s3, 16, %s47_s10, [#allocation6]  }
  0x34   :  { %3251 = dma.done.wait [#allocation3], 4096  }
  0x35   :  { %3252 = vsyncadd [#allocation3], 4294963200 }
  0x36   :  { %3253 = dma.done.wait [#allocation6], 80  }
  0x37   :  { %3254 = vsyncadd [#allocation6], 4294967216  ;;  %v147_v0 = vld [vmem:[%s4488_s1 + $0x80] sm:$0xff]  ;;  %v148_v1 = vld [vmem:[%s4488_s1 + $0x88] sm:$0xff]  ;;  %vm1068_vm0 = vcmask 1043456   ;;  %vm875_vm1 = vcmask 31744  }
  0x38   :  { %v179_v2 = vld [vmem:[%s4488_s1 + $0x180] sm:$0xff]  ;;  %v2836_v3 = vpack.c.bf16 %v148_v1, %v147_v0  ;;  %v180_v4 = vld [vmem:[%s4488_s1 + $0x188] sm:$0xff]  ;;  %v149_v11 = vld [vmem:[%s4488_s1 + $0x90] sm:$0xff]  ;;  %vm1761_vm2 = vcmask 1041409   ;;  %vm1763_vm3 = vcmask 1042434   ;;  %vm1765_vm4 = vcmask 1043459  }
  0x39   :  { %v131_v5 = vld [vmem:[%s4488_s1] sm:$0xff]  ;;  %v132_v6 = vld [vmem:[%s4488_s1 + $0x8] sm:$0xff]  ;;  %v2868_v7 = vpack.c.bf16 %v180_v4, %v179_v2  ;;  %v150_v13 = vld [vmem:[%s4488_s1 + $0x98] sm:$0xff]  ;;  %vm1767_vm5 = vcmask 1044484   ;;  %vm1769_vm6 = vcmask 1045509   ;;  %vm1771_vm7 = vcmask 1046534  }
  0x3a   :  { %v2838_v8 = vpack.c.bf16 %v132_v6, %v131_v5  ;;  %v163_v9 = vld [vmem:[%s4488_s1 + $0x100] sm:$0xff]  ;;  %v164_v10 = vld [vmem:[%s4488_s1 + $0x108] sm:$0xff]  ;;  %2837 = vmatprep.subr.bf16.mxu0 %v2836_v3  ;;  %v181_v14 = vld [vmem:[%s4488_s1 + $0x190] sm:$0xff]  ;;  %v2840_v16 = vpack.c.bf16 %v150_v13, %v149_v11  ;;  %vm1773_vm8 = vcmask 1047559   ;;  %s3263_s16 = smov [#allocation8]  }
  0x3b   :  { %v2870_v12 = vpack.c.bf16 %v164_v10, %v163_v9  ;;  %v182_v15 = vld [vmem:[%s4488_s1 + $0x198] sm:$0xff]  ;;  %2869 = vmatprep.subr.bf16.mxu1 %v2868_v7  ;;  %v133_v18 = vld [vmem:[%s4488_s1 + $0x10] sm:$0xff]  ;;  %v151_v23 = vld [vmem:[%s4488_s1 + $0xa0] sm:$0xff]  ;;  %s2315_s17 = sshll.u32 %s3263_s16, 4  ;;  %s2316_s17 = int_to_ptr.vmem [resolvable:$true] %s2315_s17 }
  0x3c   :  { %2839 = vmatpush3.bf16.msra.mxu0 %v2838_v8  ;;  %v2872_v17 = vpack.c.bf16 %v182_v15, %v181_v14  ;;  %v134_v19 = vld [vmem:[%s4488_s1 + $0x18] sm:$0xff]  ;;  %v165_v20 = vld [vmem:[%s4488_s1 + $0x110] sm:$0xff]  ;;  %v152_v24 = vld [vmem:[%s4488_s1 + $0xa8] sm:$0xff]  ;;  %s3229_s18 = scalar_lea.vmem %s2316_s17, 128  ;;  %p3234_p11 = scmp.lt.s32.totalorder %s2316_s17, %s2316_s17 }
  0x3d   :  { %2871 = vmatpush3.bf16.msra.mxu1 %v2870_v12  ;;  %v2842_v21 = vpack.c.bf16 %v134_v19, %v133_v18  ;;  %v166_v22 = vld [vmem:[%s4488_s1 + $0x118] sm:$0xff]  ;;  %2841 = vmatprep.subr.bf16.mxu0 %v2840_v16  ;;  %v2844_v26 = vpack.c.bf16 %v152_v24, %v151_v23  ;;  %v183_v27 = vld [vmem:[%s4488_s1 + $0x1a0] sm:$0xff]  ;;  %v184_v28 = vld [vmem:[%s4488_s1 + $0x1a8] sm:$0xff]  ;;  %p3230_p10 = scmp.ne.s32.totalorder %s2316_s17, %s3229_s18  ;;  %p3235_p12 = scmp.lt.s32.totalorder %s3229_s18, %s3229_s18 }
  0x3e   :  { %2873 = vmatprep.subr.bf16.mxu1 %v2872_v17  ;;  %v2874_v25 = vpack.c.bf16 %v166_v22, %v165_v20  ;;  %v135_v29 = vld [vmem:[%s4488_s1 + $0x20] sm:$0xff]  ;;  %v2876_v30 = vpack.c.bf16 %v184_v28, %v183_v27  ;;  %v136_v31 = vld [vmem:[%s4488_s1 + $0x28] sm:$0xff]  ;;  %v153_v35 = vld [vmem:[%s4488_s1 + $0xb0] sm:$0xff] }
  0x3f   :  { %v167_v32 = vld [vmem:[%s4488_s1 + $0x120] sm:$0xff]  ;;  %v168_v33 = vld [vmem:[%s4488_s1 + $0x128] sm:$0xff]  ;;  %v2846_v34 = vpack.c.bf16 %v136_v31, %v135_v29  ;;  %v154_v36 = vld [vmem:[%s4488_s1 + $0xb8] sm:$0xff]  ;;  %p3236_p13 = por %p3235_p12, %p3234_p11 }
  0x40   :  { %2843 = vmatpush3.bf16.msra.mxu0 %v2842_v21  ;;  %v185_v37 = vld [vmem:[%s4488_s1 + $0x1b0] sm:$0xff]  ;;  %v2878_v38 = vpack.c.bf16 %v168_v33, %v167_v32  ;;  %v2848_v39 = vpack.c.bf16 %v154_v36, %v153_v35  ;;  %v186_v40 = vld [vmem:[%s4488_s1 + $0x1b8] sm:$0xff]  ;;  %v155_v46 = vld [vmem:[%s4488_s1 + $0xc0] sm:$0xff] }
  0x41   :  { %2875 = vmatpush3.bf16.msra.mxu1 %v2874_v25  ;;  %2845 = vmatprep.subr.bf16.mxu0 %v2844_v26  ;;  %v137_v41 = vld [vmem:[%s4488_s1 + $0x30] sm:$0xff]  ;;  %v138_v42 = vld [vmem:[%s4488_s1 + $0x38] sm:$0xff]  ;;  %v2880_v43 = vpack.c.bf16 %v186_v40, %v185_v37  ;;  %v156_v47 = vld [vmem:[%s4488_s1 + $0xc8] sm:$0xff]  ;;  %p3237_p0 = pnand %p3236_p13, %p3230_p10 }
  0x42   :  { %2877 = vmatprep.subr.bf16.mxu1 %v2876_v30  ;;  %v169_v44 = vld [vmem:[%s4488_s1 + $0x130] sm:$0xff]  ;;  %v170_v45 = vld [vmem:[%s4488_s1 + $0x138] sm:$0xff]  ;;  %v187_v48 = vld [vmem:[%s4488_s1 + $0x1c0] sm:$0xff]  ;;  %v2850_v50 = vpack.c.bf16 %v138_v42, %v137_v41  ;;  %v2852_v52 = vpack.c.bf16 %v156_v47, %v155_v46 }
  0x43   :  { %v188_v49 = vld [vmem:[%s4488_s1 + $0x1c8] sm:$0xff]  ;;  %v2882_v51 = vpack.c.bf16 %v170_v45, %v169_v44  ;;  %v139_v53 = vld [vmem:[%s4488_s1 + $0x40] sm:$0xff]  ;;  %v157_v58 = vld [vmem:[%s4488_s1 + $0xd0] sm:$0xff] }
  0x44   :  { %2847 = vmatpush3.bf16.msra.mxu0 %v2846_v34  ;;  %v140_v54 = vld [vmem:[%s4488_s1 + $0x48] sm:$0xff]  ;;  %v171_v55 = vld [vmem:[%s4488_s1 + $0x140] sm:$0xff]  ;;  %v2884_v56 = vpack.c.bf16 %v188_v49, %v187_v48  ;;  %v158_v59 = vld [vmem:[%s4488_s1 + $0xd8] sm:$0xff] }
  0x45   :  { %2879 = vmatpush3.bf16.msra.mxu1 %v2878_v38  ;;  %2849 = vmatprep.subr.bf16.mxu0 %v2848_v39  ;;  %v172_v57 = vld [vmem:[%s4488_s1 + $0x148] sm:$0xff]  ;;  %v189_v60 = vld [vmem:[%s4488_s1 + $0x1d0] sm:$0xff]  ;;  %v190_v61 = vld [vmem:[%s4488_s1 + $0x1d8] sm:$0xff]  ;;  %v2854_v62 = vpack.c.bf16 %v140_v54, %v139_v53  ;;  %v2856_v0 = vpack.c.bf16 %v158_v59, %v157_v58 }
  0x46   :  { %2881 = vmatprep.subr.bf16.mxu1 %v2880_v43  ;;  %v2886_v63 = vpack.c.bf16 %v172_v57, %v171_v55  ;;  %v141_v1 = vld [vmem:[%s4488_s1 + $0x50] sm:$0xff]  ;;  %v142_v2 = vld [vmem:[%s4488_s1 + $0x58] sm:$0xff]  ;;  %v2888_v4 = vpack.c.bf16 %v190_v61, %v189_v60  ;;  %v159_v6 = vld [vmem:[%s4488_s1 + $0xe0] sm:$0xff] }
  0x47   :  { %v173_v3 = vld [vmem:[%s4488_s1 + $0x150] sm:$0xff]  ;;  %v174_v5 = vld [vmem:[%s4488_s1 + $0x158] sm:$0xff]  ;;  %v160_v7 = vld [vmem:[%s4488_s1 + $0xe8] sm:$0xff]  ;;  %v2858_v10 = vpack.c.bf16 %v142_v2, %v141_v1 }
  0x48   :  { %2851 = vmatpush3.bf16.msra.mxu0 %v2850_v50  ;;  %v191_v8 = vld [vmem:[%s4488_s1 + $0x1e0] sm:$0xff]  ;;  %v192_v9 = vld [vmem:[%s4488_s1 + $0x1e8] sm:$0xff]  ;;  %v2890_v13 = vpack.c.bf16 %v174_v5, %v173_v3  ;;  %v2860_v14 = vpack.c.bf16 %v160_v7, %v159_v6  ;;  %v70_v17 = vld [vmem:[#allocation2 + $0x18] sm:$0xff] }
  0x49   :  { %2883 = vmatpush3.bf16.msra.mxu1 %v2882_v51  ;;  %2853 = vmatprep.subr.bf16.mxu0 %v2852_v52  ;;  %v143_v11 = vld [vmem:[%s4488_s1 + $0x60] sm:$0xff]  ;;  %v144_v12 = vld [vmem:[%s4488_s1 + $0x68] sm:$0xff]  ;;  %v2892_v18 = vpack.c.bf16 %v192_v9, %v191_v8  ;;  %v161_v20 = vld [vmem:[%s4488_s1 + $0xf0] sm:$0xff]  ;;  %v102_v23 = vmax.f32 %v70_v17, 0.0 }
  0x4a   :  { %2885 = vmatprep.subr.bf16.mxu1 %v2884_v56  ;;  %v175_v15 = vld [vmem:[%s4488_s1 + $0x160] sm:$0xff]  ;;  %v68_v16 = vld [vmem:[#allocation2 + $0x8] sm:$0xff]  ;;  %v162_v21 = vld [vmem:[%s4488_s1 + $0xf8] sm:$0xff]  ;;  %v2862_v26 = vpack.c.bf16 %v144_v12, %v143_v11 }
  0x4b   :  { %v176_v19 = vld [vmem:[%s4488_s1 + $0x168] sm:$0xff]  ;;  %v100_v22 = vmax.f32 %v68_v16, 0.0  ;;  %v193_v24 = vld [vmem:[%s4488_s1 + $0x1f0] sm:$0xff]  ;;  %v194_v25 = vld [vmem:[%s4488_s1 + $0x1f8] sm:$0xff]  ;;  %v2864_v28 = vpack.c.bf16 %v162_v21, %v161_v20  ;;  %408 = vmatprep.mubr.f32.mxu1 %v102_v23 }
  0x4c   :  { %2855 = vmatpush3.bf16.msra.mxu0 %v2854_v62  ;;  %v2894_v27 = vpack.c.bf16 %v176_v19, %v175_v15  ;;  %v145_v29 = vld [vmem:[%s4488_s1 + $0x70] sm:$0xff]  ;;  %v146_v30 = vld [vmem:[%s4488_s1 + $0x78] sm:$0xff]  ;;  %v2896_v32 = vpack.c.bf16 %v194_v25, %v193_v24  ;;  %v211_v34 = vld [vmem:[%s4488_s1 + $0x280] sm:$0xff] }
  0x4d   :  { %2887 = vmatpush3.bf16.msra.mxu1 %v2886_v63  ;;  %2857 = vmatprep.subr.bf16.mxu0 %v2856_v0  ;;  %v177_v31 = vld [vmem:[%s4488_s1 + $0x170] sm:$0xff]  ;;  %v178_v33 = vld [vmem:[%s4488_s1 + $0x178] sm:$0xff]  ;;  %v212_v35 = vld [vmem:[%s4488_s1 + $0x288] sm:$0xff]  ;;  %v2866_v38 = vpack.c.bf16 %v146_v30, %v145_v29 }
  0x4e   :  { %2889 = vmatprep.subr.bf16.mxu1 %v2888_v4  ;;  %323 = vmatprep.mubr.f32.mxu0 %v100_v22  ;;  %v243_v36 = vld [vmem:[%s4488_s1 + $0x380] sm:$0xff]  ;;  %v244_v37 = vld [vmem:[%s4488_s1 + $0x388] sm:$0xff]  ;;  %v69_v40 = vld [vmem:[#allocation2 + $0x10] sm:$0xff]  ;;  %v2898_v41 = vpack.c.bf16 %v178_v33, %v177_v31  ;;  %v2900_v42 = vpack.c.bf16 %v212_v35, %v211_v34 }
  0x4f   :  { %v67_v39 = vld [vmem:[#allocation2] sm:$0xff]  ;;  %v196_v44 = vld [vmem:[%s4488_s1 + $0x208] sm:$0xff]  ;;  %v2932_v46 = vpack.c.bf16 %v244_v37, %v243_v36  ;;  %v213_v48 = vld [vmem:[%s4488_s1 + $0x290] sm:$0xff]  ;;  %v101_v53 = vmax.f32 %v69_v40, 0.0 }
  0x50   :  { %2859 = vmatpush3.bf16.msra.mxu0 %v2858_v10  ;;  %v195_v43 = vld [vmem:[%s4488_s1 + $0x200] sm:$0xff]  ;;  %v228_v47 = vld [vmem:[%s4488_s1 + $0x308] sm:$0xff]  ;;  %v214_v49 = vld [vmem:[%s4488_s1 + $0x298] sm:$0xff]  ;;  %v99_v50 = vmax.f32 %v67_v39, 0.0 }
  0x51   :  { %2891 = vmatpush3.bf16.msra.mxu1 %v2890_v13  ;;  %2861 = vmatprep.subr.bf16.mxu0 %v2860_v14  ;;  %v227_v45 = vld [vmem:[%s4488_s1 + $0x300] sm:$0xff]  ;;  %v245_v51 = vld [vmem:[%s4488_s1 + $0x390] sm:$0xff]  ;;  %v246_v52 = vld [vmem:[%s4488_s1 + $0x398] sm:$0xff]  ;;  %v2902_v54 = vpack.c.bf16 %v196_v44, %v195_v43  ;;  %v2904_v57 = vpack.c.bf16 %v214_v49, %v213_v48 }
  0x52   :  { %2893 = vmatprep.subr.bf16.mxu1 %v2892_v18  ;;  %v197_v55 = vld [vmem:[%s4488_s1 + $0x210] sm:$0xff]  ;;  %v2934_v56 = vpack.c.bf16 %v228_v47, %v227_v45  ;;  %v198_v58 = vld [vmem:[%s4488_s1 + $0x218] sm:$0xff]  ;;  %v2936_v61 = vpack.c.bf16 %v246_v52, %v245_v51  ;;  %v215_v62 = vld [vmem:[%s4488_s1 + $0x2a0] sm:$0xff] }
  0x53   :  { %v229_v59 = vld [vmem:[%s4488_s1 + $0x310] sm:$0xff]  ;;  %v230_v60 = vld [vmem:[%s4488_s1 + $0x318] sm:$0xff]  ;;  %v216_v63 = vld [vmem:[%s4488_s1 + $0x2a8] sm:$0xff]  ;;  %v2906_v4 = vpack.c.bf16 %v198_v58, %v197_v55 }
  0x54   :  { %2863 = vmatpush3.bf16.msra.mxu0 %v2862_v26  ;;  %v247_v0 = vld [vmem:[%s4488_s1 + $0x3a0] sm:$0xff]  ;;  %v248_v1 = vld [vmem:[%s4488_s1 + $0x3a8] sm:$0xff]  ;;  %v78_v3 = vld [vmem:[#allocation2 + $0x58] sm:$0xff]  ;;  %v2938_v10 = vpack.c.bf16 %v230_v60, %v229_v59  ;;  %v2908_v11 = vpack.c.bf16 %v216_v63, %v215_v62 }
  0x55   :  { %2895 = vmatpush3.bf16.msra.mxu1 %v2894_v27  ;;  %2865 = vmatprep.subr.bf16.mxu0 %v2864_v28  ;;  %v76_v2 = vld [vmem:[#allocation2 + $0x48] sm:$0xff]  ;;  %v199_v5 = vld [vmem:[%s4488_s1 + $0x220] sm:$0xff]  ;;  %v110_v8 = vmax.f32 %v78_v3, 0.0  ;;  %v77_v15 = vld [vmem:[#allocation2 + $0x50] sm:$0xff]  ;;  %v2940_v16 = vpack.c.bf16 %v248_v1, %v247_v0 }
  0x56   :  { %2897 = vmatprep.subr.bf16.mxu1 %v2896_v32  ;;  %v200_v6 = vld [vmem:[%s4488_s1 + $0x228] sm:$0xff]  ;;  %v108_v7 = vmax.f32 %v76_v2, 0.0  ;;  %v75_v9 = vld [vmem:[#allocation2 + $0x40] sm:$0xff]  ;;  %v217_v17 = vld [vmem:[%s4488_s1 + $0x2b0] sm:$0xff]  ;;  %v109_v20 = vmax.f32 %v77_v15, 0.0 }
  0x57   :  { %v231_v12 = vld [vmem:[%s4488_s1 + $0x320] sm:$0xff]  ;;  %v232_v13 = vld [vmem:[%s4488_s1 + $0x328] sm:$0xff]  ;;  %v107_v14 = vmax.f32 %v75_v9, 0.0  ;;  %v218_v18 = vld [vmem:[%s4488_s1 + $0x2b8] sm:$0xff]  ;;  %v2910_v24 = vpack.c.bf16 %v200_v6, %v199_v5 }
  0x58   :  { %2867 = vmatpush3.bf16.msra.mxu0 %v2866_v38  ;;  %v249_v19 = vld [vmem:[%s4488_s1 + $0x3b0] sm:$0xff]  ;;  %v250_v21 = vld [vmem:[%s4488_s1 + $0x3b8] sm:$0xff]  ;;  %v84_v22 = vld [vmem:[#allocation2 + $0x88] sm:$0xff]  ;;  %v2942_v30 = vpack.c.bf16 %v232_v13, %v231_v12  ;;  %v2912_v31 = vpack.c.bf16 %v218_v18, %v217_v17 }
  0x59   :  { %2899 = vmatpush3.bf16.msra.mxu1 %v2898_v41  ;;  %2901 = vmatprep.subr.bf16.mxu0 %v2900_v42  ;;  %v86_v23 = vld [vmem:[#allocation2 + $0x98] sm:$0xff]  ;;  %v201_v25 = vld [vmem:[%s4488_s1 + $0x230] sm:$0xff]  ;;  %v116_v27 = vmax.f32 %v84_v22, 0.0  ;;  %v83_v29 = vld [vmem:[#allocation2 + $0x80] sm:$0xff]  ;;  %v2944_v36 = vpack.c.bf16 %v250_v21, %v249_v19 }
  0x5a   :  { %2933 = vmatprep.subr.bf16.mxu1 %v2932_v46  ;;  %v202_v26 = vld [vmem:[%s4488_s1 + $0x238] sm:$0xff]  ;;  %v118_v28 = vmax.f32 %v86_v23, 0.0  ;;  %v233_v32 = vld [vmem:[%s4488_s1 + $0x330] sm:$0xff]  ;;  %v115_v34 = vmax.f32 %v83_v29, 0.0  ;;  %v219_v37 = vld [vmem:[%s4488_s1 + $0x2c0] sm:$0xff] }
  0x5b   :  { %324 = vmatmul.mubr.f32.vlgmr.msra.gmra.mrb[0].mxu0 %v99_v50  ;;  %v234_v33 = vld [vmem:[%s4488_s1 + $0x338] sm:$0xff]  ;;  %v85_v35 = vld [vmem:[#allocation2 + $0x90] sm:$0xff]  ;;  %v220_v38 = vld [vmem:[%s4488_s1 + $0x2c8] sm:$0xff]  ;;  %v2914_v44 = vpack.c.bf16 %v202_v26, %v201_v25 }
  0x5c   :  { %409 = vmatmul.mubr.f32.vlgmr.msra.gmra.mrb[0].mxu1 %v101_v53  ;;  %2903 = vmatpush3.bf16.msra.mxu0 %v2902_v54  ;;  %v251_v39 = vld [vmem:[%s4488_s1 + $0x3c0] sm:$0xff]  ;;  %v117_v40 = vmax.f32 %v85_v35, 0.0  ;;  %v252_v41 = vld [vmem:[%s4488_s1 + $0x3c8] sm:$0xff]  ;;  %v94_v43 = vld [vmem:[#allocation2 + $0xd8] sm:$0xff]  ;;  %v2946_v49 = vpack.c.bf16 %v234_v33, %v233_v32  ;;  %v2916_v50 = vpack.c.bf16 %v220_v38, %v219_v37 }
  0x5d   :  { %2935 = vmatpush3.bf16.msra.mxu1 %v2934_v56  ;;  %2905 = vmatprep.subr.bf16.mxu0 %v2904_v57  ;;  %v92_v42 = vld [vmem:[#allocation2 + $0xc8] sm:$0xff]  ;;  %v203_v45 = vld [vmem:[%s4488_s1 + $0x240] sm:$0xff]  ;;  %v126_v47 = vmax.f32 %v94_v43, 0.0  ;;  %v93_v54 = vld [vmem:[#allocation2 + $0xd0] sm:$0xff]  ;;  %v2948_v55 = vpack.c.bf16 %v252_v41, %v251_v39 }
  0x5e   :  { %2937 = vmatprep.subr.bf16.mxu1 %v2936_v61  ;;  %328 = vmatprep.mubr.f32.mxu0 %v108_v7  ;;  %v124_v46 = vmax.f32 %v92_v42, 0.0  ;;  %v91_v48 = vld [vmem:[#allocation2 + $0xc0] sm:$0xff]  ;;  %v204_v51 = vld [vmem:[%s4488_s1 + $0x248] sm:$0xff]  ;;  %v221_v57 = vld [vmem:[%s4488_s1 + $0x2d0] sm:$0xff]  ;;  %v125_v59 = vmax.f32 %v93_v54, 0.0 }
  0x5f   :  { %413 = vmatprep.mubr.f32.mxu1 %v110_v8  ;;  %329 = vmatmul.mubr.f32.gmra.mrb[2].mxu0 %v107_v14  ;;  %v235_v52 = vld [vmem:[%s4488_s1 + $0x340] sm:$0xff]  ;;  %v123_v53 = vmax.f32 %v91_v48, 0.0  ;;  %v236_v56 = vld [vmem:[%s4488_s1 + $0x348] sm:$0xff]  ;;  %v222_v58 = vld [vmem:[%s4488_s1 + $0x2d8] sm:$0xff]  ;;  %v2918_v62 = vpack.c.bf16 %v204_v51, %v203_v45 }
  0x60   :  { %2907 = vmatpush3.bf16.msra.mxu0 %v2906_v4  ;;  %414 = vmatmul.mubr.f32.gmra.mrb[2].mxu1 %v109_v20  ;;  %v253_v60 = vld [vmem:[%s4488_s1 + $0x3d0] sm:$0xff]  ;;  %v254_v61 = vld [vmem:[%s4488_s1 + $0x3d8] sm:$0xff]  ;;  %v72_v63 = vld [vmem:[#allocation2 + $0x28] sm:$0xff]  ;;  %v2950_v1 = vpack.c.bf16 %v236_v56, %v235_v52  ;;  %v2920_v2 = vpack.c.bf16 %v222_v58, %v221_v57 }
  0x61   :  { %2939 = vmatpush3.bf16.msra.mxu1 %v2938_v10  ;;  %2909 = vmatprep.subr.bf16.mxu0 %v2908_v11  ;;  %v74_v0 = vld [vmem:[#allocation2 + $0x38] sm:$0xff]  ;;  %v205_v3 = vld [vmem:[%s4488_s1 + $0x250] sm:$0xff]  ;;  %v104_v6 = vmax.f32 %v72_v63, 0.0  ;;  %v2952_v8 = vpack.c.bf16 %v254_v61, %v253_v60  ;;  %v223_v10 = vld [vmem:[%s4488_s1 + $0x2e0] sm:$0xff] }
  0x62   :  { %2941 = vmatprep.subr.bf16.mxu1 %v2940_v16  ;;  %333 = vmatprep.mubr.f32.mxu0 %v116_v27  ;;  %v206_v4 = vld [vmem:[%s4488_s1 + $0x258] sm:$0xff]  ;;  %v237_v5 = vld [vmem:[%s4488_s1 + $0x350] sm:$0xff]  ;;  %v106_v7 = vmax.f32 %v74_v0, 0.0  ;;  %v224_v11 = vld [vmem:[%s4488_s1 + $0x2e8] sm:$0xff] }
  0x63   :  { %418 = vmatprep.mubr.f32.mxu1 %v118_v28  ;;  %334 = vmatmul.mubr.f32.gmra.mrb[4].mxu0 %v115_v34  ;;  %v238_v9 = vld [vmem:[%s4488_s1 + $0x358] sm:$0xff]  ;;  %v255_v12 = vld [vmem:[%s4488_s1 + $0x3e0] sm:$0xff]  ;;  %v256_v13 = vld [vmem:[%s4488_s1 + $0x3e8] sm:$0xff]  ;;  %v2922_v14 = vpack.c.bf16 %v206_v4, %v205_v3  ;;  %v2924_v16 = vpack.c.bf16 %v224_v11, %v223_v10 }
  0x64   :  { %2911 = vmatpush3.bf16.msra.mxu0 %v2910_v24  ;;  %419 = vmatmul.mubr.f32.gmra.mrb[4].mxu1 %v117_v40  ;;  %v2954_v15 = vpack.c.bf16 %v238_v9, %v237_v5  ;;  %v207_v17 = vld [vmem:[%s4488_s1 + $0x260] sm:$0xff]  ;;  %v208_v18 = vld [vmem:[%s4488_s1 + $0x268] sm:$0xff]  ;;  %v2956_v20 = vpack.c.bf16 %v256_v13, %v255_v12  ;;  %v225_v22 = vld [vmem:[%s4488_s1 + $0x2f0] sm:$0xff] }
  0x65   :  { %2943 = vmatpush3.bf16.msra.mxu1 %v2942_v30  ;;  %2913 = vmatprep.subr.bf16.mxu0 %v2912_v31  ;;  %v239_v19 = vld [vmem:[%s4488_s1 + $0x360] sm:$0xff]  ;;  %v240_v21 = vld [vmem:[%s4488_s1 + $0x368] sm:$0xff]  ;;  %v226_v23 = vld [vmem:[%s4488_s1 + $0x2f8] sm:$0xff]  ;;  %v2926_v26 = vpack.c.bf16 %v208_v18, %v207_v17 }
  0x66   :  { %2945 = vmatprep.subr.bf16.mxu1 %v2944_v36  ;;  %338 = vmatprep.mubr.f32.mxu0 %v124_v46  ;;  %v257_v24 = vld [vmem:[%s4488_s1 + $0x3f0] sm:$0xff]  ;;  %v258_v25 = vld [vmem:[%s4488_s1 + $0x3f8] sm:$0xff]  ;;  %v2958_v27 = vpack.c.bf16 %v240_v21, %v239_v19  ;;  %v2928_v28 = vpack.c.bf16 %v226_v23, %v225_v22  ;;  %v71_v35 = vld [vmem:[#allocation2 + $0x20] sm:$0xff] }
  0x67   :  { %423 = vmatprep.mubr.f32.mxu1 %v126_v47  ;;  %339 = vmatmul.mubr.f32.gmra.mrb[6].mxu0 %v123_v53  ;;  %v209_v29 = vld [vmem:[%s4488_s1 + $0x270] sm:$0xff]  ;;  %v210_v30 = vld [vmem:[%s4488_s1 + $0x278] sm:$0xff]  ;;  %v2960_v31 = vpack.c.bf16 %v258_v25, %v257_v24  ;;  %v80_v38 = vld [vmem:[#allocation2 + $0x68] sm:$0xff]  ;;  %v103_v40 = vmax.f32 %v71_v35, 0.0 }
  0x68   :  { %2915 = vmatpush3.bf16.msra.mxu0 %v2914_v44  ;;  %424 = vmatmul.mubr.f32.gmra.mrb[6].mxu1 %v125_v59  ;;  %v241_v32 = vld [vmem:[%s4488_s1 + $0x370] sm:$0xff]  ;;  %v242_v33 = vld [vmem:[%s4488_s1 + $0x378] sm:$0xff]  ;;  %v2930_v34 = vpack.c.bf16 %v210_v30, %v209_v29  ;;  %v112_v42 = vmax.f32 %v80_v38, 0.0  ;;  %v79_v43 = vld [vmem:[#allocation2 + $0x60] sm:$0xff] }
  0x69   :  { %2947 = vmatpush3.bf16.msra.mxu1 %v2946_v49  ;;  %2917 = vmatprep.subr.bf16.mxu0 %v2916_v50  ;;  %v2962_v36 = vpack.c.bf16 %v242_v33, %v241_v32  ;;  %v73_v37 = vld [vmem:[#allocation2 + $0x30] sm:$0xff]  ;;  %v82_v39 = vld [vmem:[#allocation2 + $0x78] sm:$0xff]  ;;  %v88_v46 = vld [vmem:[#allocation2 + $0xa8] sm:$0xff]  ;;  %v111_v48 = vmax.f32 %v79_v43, 0.0 }
  0x6a   :  { %2949 = vmatprep.subr.bf16.mxu1 %v2948_v55  ;;  %493 = vmatprep.mubr.f32.mxu0 %v104_v6  ;;  %v105_v41 = vmax.f32 %v73_v37, 0.0  ;;  %v114_v44 = vmax.f32 %v82_v39, 0.0  ;;  %v81_v45 = vld [vmem:[#allocation2 + $0x70] sm:$0xff]  ;;  %v90_v47 = vld [vmem:[#allocation2 + $0xb8] sm:$0xff]  ;;  %v120_v50 = vmax.f32 %v88_v46, 0.0  ;;  %v87_v51 = vld [vmem:[#allocation2 + $0xa0] sm:$0xff] }
  0x6b   :  { %578 = vmatprep.mubr.f32.mxu1 %v106_v7  ;;  %v113_v49 = vmax.f32 %v81_v45, 0.0  ;;  %v122_v52 = vmax.f32 %v90_v47, 0.0  ;;  %v89_v53 = vld [vmem:[#allocation2 + $0xb0] sm:$0xff]  ;;  %v96_v54 = vld [vmem:[#allocation2 + $0xe8] sm:$0xff]  ;;  %v98_v55 = vld [vmem:[#allocation2 + $0xf8] sm:$0xff]  ;;  %v119_v56 = vmax.f32 %v87_v51, 0.0 }
  0x6c   :  { %2919 = vmatpush3.bf16.msra.mxu0 %v2918_v62  ;;  %v121_v57 = vmax.f32 %v89_v53, 0.0  ;;  %v128_v58 = vmax.f32 %v96_v54, 0.0  ;;  %v95_v59 = vld [vmem:[#allocation2 + $0xe0] sm:$0xff]  ;;  %v130_v60 = vmax.f32 %v98_v55, 0.0  ;;  %v97_v61 = vld [vmem:[#allocation2 + $0xf0] sm:$0xff] }
  0x6d   :  { %2951 = vmatpush3.bf16.msra.mxu1 %v2950_v1  ;;  %2921 = vmatprep.subr.bf16.mxu0 %v2920_v2  ;;  %v127_v62 = vmax.f32 %v95_v59, 0.0  ;;  %v129_v63 = vmax.f32 %v97_v61, 0.0  ;;  %v867_v46 = vld [vmem:[#allocation5] sm:$0xf] }
  0x6e   :  { %2953 = vmatprep.subr.bf16.mxu1 %v2952_v8 }
  0x70   :  { %2923 = vmatpush3.bf16.msra.mxu0 %v2922_v14 }
  0x71   :  { %2955 = vmatpush3.bf16.msra.mxu1 %v2954_v15  ;;  %2925 = vmatprep.subr.bf16.mxu0 %v2924_v16 }
  0x72   :  { %2957 = vmatprep.subr.bf16.mxu1 %v2956_v20 }
  0x74   :  { %2927 = vmatpush3.bf16.msra.mxu0 %v2926_v26 }
  0x75   :  { %2959 = vmatpush3.bf16.msra.mxu1 %v2958_v27  ;;  %2929 = vmatprep.subr.bf16.mxu0 %v2928_v28 }
  0x76   :  { %2961 = vmatprep.subr.bf16.mxu1 %v2960_v31 }
  0x78   :  { %2931 = vmatpush3.bf16.msra.mxu0 %v2930_v34 }
  0x79   :  { %2963 = vmatpush3.bf16.msra.mxu1 %v2962_v36  ;;  %2738 = vmatprep.subr.msk.mxu0 %vm1068_vm0, %v867_v46 }
  0x7b   :  { %494 = vmatmul.mubr.f32.vlgmr.msra.gmra.mrb[8].mxu0 %v103_v40 }
  0x7c   :  { %579 = vmatmul.mubr.f32.vlgmr.msra.gmra.mrb[8].mxu1 %v105_v41  ;;  %498 = vmatprep.mubr.f32.mxu0 %v112_v42 }
  0x7d   :  { %583 = vmatprep.mubr.f32.mxu1 %v114_v44  ;;  %2739 = vmatpush3.msk.msra.mxu0 %vm1068_vm0, %v867_v46 }
  0x7f   :  { %499 = vmatmul.mubr.f32.gmra.mrb[10].mxu0 %v111_v48 }
  0x80   :  { %584 = vmatmul.mubr.f32.gmra.mrb[10].mxu1 %v113_v49  ;;  %503 = vmatprep.mubr.f32.mxu0 %v120_v50 }
  0x81   :  { %588 = vmatprep.mubr.f32.mxu1 %v122_v52 }
  0x83   :  { %504 = vmatmul.mubr.f32.gmra.mrb[12].mxu0 %v119_v56 }
  0x84   :  { %589 = vmatmul.mubr.f32.gmra.mrb[12].mxu1 %v121_v57  ;;  %508 = vmatprep.mubr.f32.mxu0 %v128_v58 }
  0x85   :  { %593 = vmatprep.mubr.f32.mxu1 %v130_v60 }
  0x87   :  { %509 = vmatmul.mubr.f32.gmra.mrb[14].mxu0 %v127_v62 }
  0x88   :  { %594 = vmatmul.mubr.f32.gmra.mrb[14].mxu1 %v129_v63 }
 0x12e   :  { %v2424_v0 = vpop.f32.mrb[0].mxu0 }
 0x12f   :  { %v2468_v1 = vpop.f32.mrb[0].mxu1  ;;  %v2425_v2 = vpop.f32.mrb[1].mxu0 }
 0x130   :  { %v2426_v3 = vadd.f32 %v2425_v2, %v2424_v0  ;;  %v2469_v4 = vpop.f32.mrb[1].mxu1 }
 0x131   :  { %v2470_v5 = vadd.f32 %v2469_v4, %v2468_v1 }
 0x132   :  { %v2427_v6 = vpop.f32.mrb[2].mxu0 }
 0x133   :  { %v411_v7 = vadd.f32 %v2470_v5, %v2426_v3  ;;  %v2471_v8 = vpop.f32.mrb[2].mxu1  ;;  %v2428_v9 = vpop.f32.mrb[3].mxu0 }
 0x134   :  { %v2429_v10 = vadd.f32 %v2428_v9, %v2427_v6  ;;  %v2472_v11 = vpop.f32.mrb[3].mxu1 }
 0x135   :  { %v2473_v12 = vadd.f32 %v2472_v11, %v2471_v8 }
 0x136   :  { %v2430_v13 = vpop.f32.mrb[4].mxu0 }
 0x137   :  { %v416_v14 = vadd.f32 %v2473_v12, %v2429_v10  ;;  %v2474_v15 = vpop.f32.mrb[4].mxu1  ;;  %v2431_v16 = vpop.f32.mrb[5].mxu0 }
 0x138   :  { %v2432_v17 = vadd.f32 %v2431_v16, %v2430_v13  ;;  %v2475_v18 = vpop.f32.mrb[5].mxu1 }
 0x139   :  { %v2476_v19 = vadd.f32 %v2475_v18, %v2474_v15 }
 0x13a   :  { %v2433_v20 = vpop.f32.mrb[6].mxu0 }
 0x13b   :  { %v421_v21 = vadd.f32 %v2476_v19, %v2432_v17  ;;  %v2477_v22 = vpop.f32.mrb[6].mxu1  ;;  %v2434_v23 = vpop.f32.mrb[7].mxu0 }
 0x13c   :  { %v2435_v24 = vadd.f32 %v2434_v23, %v2433_v20  ;;  %v2478_v25 = vpop.f32.mrb[7].mxu1 }
 0x13d   :  { %v2479_v26 = vadd.f32 %v2478_v25, %v2477_v22 }
 0x13f   :  { %v426_v27 = vadd.f32 %v2479_v26, %v2435_v24 }
 0x14e   :  { %v2512_v28 = vpop.f32.mrb[8].mxu0 }
 0x14f   :  { %v2513_v29 = vpop.f32.mrb[9].mxu0  ;;  %v2556_v30 = vpop.f32.mrb[8].mxu1 }
 0x150   :  { %v2514_v31 = vadd.f32 %v2513_v29, %v2512_v28  ;;  %v2557_v32 = vpop.f32.mrb[9].mxu1 }
 0x151   :  { %v2558_v33 = vadd.f32 %v2557_v32, %v2556_v30 }
 0x152   :  { %v496_v34 = vadd.f32 %v2514_v31, %v411_v7  ;;  %v2515_v35 = vpop.f32.mrb[10].mxu0 }
 0x153   :  { %v2516_v36 = vpop.f32.mrb[11].mxu0  ;;  %v2559_v37 = vpop.f32.mrb[10].mxu1 }
 0x154   :  { %v2517_v38 = vadd.f32 %v2516_v36, %v2515_v35  ;;  %v2560_v39 = vpop.f32.mrb[11].mxu1  ;;  %v581_v40 = vadd.f32 %v2558_v33, %v496_v34 }
 0x155   :  { %v2561_v41 = vadd.f32 %v2560_v39, %v2559_v37 }
 0x156   :  { %v501_v42 = vadd.f32 %v2517_v38, %v416_v14  ;;  %v2518_v43 = vpop.f32.mrb[12].mxu0  ;;  %611 = vxpose.xlu0.b32.start.end [1/1] (short) (narrow) %v581_v40, 64  ;;  %v603_v61 = vcombine.high %v581_v40, %v581_v40 }
 0x157   :  { %v2519_v44 = vpop.f32.mrb[13].mxu0  ;;  %v2562_v45 = vpop.f32.mrb[12].mxu1 }
 0x158   :  { %v2520_v47 = vadd.f32 %v2519_v44, %v2518_v43  ;;  %v2563_v48 = vpop.f32.mrb[13].mxu1  ;;  %v586_v49 = vadd.f32 %v2561_v41, %v501_v42 }
 0x159   :  { %v2564_v50 = vadd.f32 %v2563_v48, %v2562_v45 }
 0x15a   :  { %v506_v51 = vadd.f32 %v2520_v47, %v421_v21  ;;  %v2521_v52 = vpop.f32.mrb[14].mxu0  ;;  %675 = vxpose.xlu1.b32.start.end [1/1] (short) (narrow) %v586_v49, 64  ;;  %v604_v62 = vcombine.high %v586_v49, %v586_v49 }
 0x15b   :  { %v2522_v53 = vpop.f32.mrb[15].mxu0  ;;  %v2565_v54 = vpop.f32.mrb[14].mxu1 }
 0x15c   :  { %v2523_v55 = vadd.f32 %v2522_v53, %v2521_v52  ;;  %v2566_v56 = vpop.f32.mrb[15].mxu1  ;;  %v591_v57 = vadd.f32 %v2564_v50, %v506_v51 }
 0x15d   :  { %v2567_v58 = vadd.f32 %v2566_v56, %v2565_v54 }
 0x15e   :  { %v511_v59 = vadd.f32 %v2523_v55, %v426_v27  ;;  %v605_v63 = vcombine.high %v591_v57, %v591_v57 }
 0x160   :  { %v596_v60 = vadd.f32 %v2567_v58, %v511_v59 }
 0x162   :  { %v606_v0 = vcombine.high %v596_v60, %v596_v60 }
 0x173   :  { %643 = vxpose.xlu0.b32.start.end [1/1] (short) (narrow) %v603_v61, 64 }
 0x177   :  { %707 = vxpose.xlu1.b32.start.end [1/1] (short) (narrow) %v604_v62, 64 }
 0x190   :  { %739 = vxpose.xlu0.b32.start.end [1/1] (short) (narrow) %v591_v57, 64 }
 0x194   :  { %771 = vxpose.xlu1.b32.start.end [1/1] (short) (narrow) %v605_v63, 64 }
 0x1ad   :  { %803 = vxpose.xlu0.b32.start.end [1/1] (short) (narrow) %v596_v60, 64 }
 0x1b1   :  { %835 = vxpose.xlu1.b32.start.end [1/1] (short) (narrow) %v606_v0, 64 }
 0x1d6   :  { %v627_v1 = vpop.trf.xlu0 }
 0x1d7   :  { %2740 = vmatprep.mubr.msk.f32.mxu0 %vm875_vm1, %v627_v1  ;;  %v3800_v1 = vld [vmem:[#allocation7] ss:$0 sm:$0xff] }
 0x1da   :  { %v628_v2 = vpop.trf.xlu0  ;;  %v691_v3 = vpop.trf.xlu1 }
 0x1db   :  { %2741 = vmatmul.mubr.msk.f32.vlgmr.msra.gmra.mrb[16].mxu0 %vm875_vm1, %v628_v2 }
 0x1de   :  { %v629_v4 = vpop.trf.xlu0  ;;  %v692_v5 = vpop.trf.xlu1 }
 0x1df   :  { %2743 = vmatprep.mubr.msk.f32.mxu0 %vm875_vm1, %v629_v4 }
 0x1e2   :  { %v630_v6 = vpop.trf.xlu0  ;;  %v693_v7 = vpop.trf.xlu1 }
 0x1e3   :  { %2744 = vmatmul.mubr.msk.f32.gmra.mrb[18].mxu0 %vm875_vm1, %v630_v6 }
 0x1e6   :  { %v631_v8 = vpop.trf.xlu0  ;;  %v694_v9 = vpop.trf.xlu1 }
 0x1e7   :  { %2746 = vmatprep.mubr.msk.f32.mxu0 %vm875_vm1, %v631_v8 }
 0x1ea   :  { %v632_v10 = vpop.trf.xlu0  ;;  %v695_v11 = vpop.trf.xlu1 }
 0x1eb   :  { %2747 = vmatmul.mubr.msk.f32.gmra.mrb[20].mxu0 %vm875_vm1, %v632_v10 }
 0x1ee   :  { %v633_v12 = vpop.trf.xlu0  ;;  %v696_v13 = vpop.trf.xlu1 }
 0x1ef   :  { %2749 = vmatprep.mubr.msk.f32.mxu0 %vm875_vm1, %v633_v12 }
 0x1f2   :  { %v634_v14 = vpop.trf.xlu0  ;;  %v697_v15 = vpop.trf.xlu1 }
 0x1f3   :  { %2750 = vmatmul.mubr.msk.f32.gmra.mrb[22].mxu0 %vm875_vm1, %v634_v14  ;;  %v1626_v14 = vld [vmem:[%s4491_s4 + $0x8] sm:$0xff] }
 0x1f6   :  { %v659_v16 = vpop.trf.xlu0  ;;  %v698_v17 = vpop.trf.xlu1 }
 0x1f7   :  { %2752 = vmatprep.mubr.msk.f32.mxu0 %vm875_vm1, %v659_v16 }
 0x1fa   :  { %v660_v18 = vpop.trf.xlu0  ;;  %v723_v19 = vpop.trf.xlu1 }
 0x1fb   :  { %2753 = vmatmul.mubr.msk.f32.gmra.mrb[24].mxu0 %vm875_vm1, %v660_v18  ;;  %v1631_v18 = vld [vmem:[%s4491_s4 + $0x30] sm:$0xff] }
 0x1fe   :  { %v661_v20 = vpop.trf.xlu0  ;;  %v724_v21 = vpop.trf.xlu1 }
 0x1ff   :  { %2755 = vmatprep.mubr.msk.f32.mxu0 %vm875_vm1, %v661_v20 }
 0x202   :  { %v662_v22 = vpop.trf.xlu0  ;;  %v725_v23 = vpop.trf.xlu1 }
 0x203   :  { %2756 = vmatmul.mubr.msk.f32.gmra.mrb[26].mxu0 %vm875_vm1, %v662_v22 }
 0x206   :  { %v663_v24 = vpop.trf.xlu0  ;;  %v726_v25 = vpop.trf.xlu1 }
 0x207   :  { %2758 = vmatprep.mubr.msk.f32.mxu0 %vm875_vm1, %v663_v24  ;;  %v1638_v24 = vld [vmem:[%s4491_s4 + $0x68] sm:$0xff] }
 0x20a   :  { %v664_v26 = vpop.trf.xlu0  ;;  %v727_v27 = vpop.trf.xlu1 }
 0x20b   :  { %2759 = vmatmul.mubr.msk.f32.gmra.mrb[28].mxu0 %vm875_vm1, %v664_v26 }
 0x20e   :  { %v665_v28 = vpop.trf.xlu0  ;;  %v728_v29 = vpop.trf.xlu1 }
 0x20f   :  { %2761 = vmatprep.mubr.msk.f32.mxu0 %vm875_vm1, %v665_v28  ;;  %v1637_v28 = vld [vmem:[%s4491_s4 + $0x60] sm:$0xff] }
 0x212   :  { %v666_v30 = vpop.trf.xlu0  ;;  %v729_v31 = vpop.trf.xlu1 }
 0x213   :  { %2762 = vmatmul.mubr.msk.f32.gmra.mrb[30].mxu0 %vm875_vm1, %v666_v30 }
 0x214   :  { %2764 = vmatprep.mubr.msk.f32.mxu0 %vm875_vm1, %v691_v3 }
 0x216   :  { %v755_v32 = vpop.trf.xlu0  ;;  %v730_v33 = vpop.trf.xlu1 }
 0x217   :  { %2765 = vmatmul.mubr.msk.f32.gmra.mrb[32].mxu0 %vm875_vm1, %v692_v5 }
 0x218   :  { %2767 = vmatprep.mubr.msk.f32.mxu0 %vm875_vm1, %v693_v7 }
 0x21a   :  { %v756_v34 = vpop.trf.xlu0  ;;  %v787_v35 = vpop.trf.xlu1 }
 0x21b   :  { %2768 = vmatmul.mubr.msk.f32.gmra.mrb[34].mxu0 %vm875_vm1, %v694_v9 }
 0x21c   :  { %2770 = vmatprep.mubr.msk.f32.mxu0 %vm875_vm1, %v695_v11 }
 0x21e   :  { %v757_v36 = vpop.trf.xlu0  ;;  %v788_v37 = vpop.trf.xlu1 }
 0x21f   :  { %2771 = vmatmul.mubr.msk.f32.gmra.mrb[36].mxu0 %vm875_vm1, %v696_v13 }
 0x220   :  { %2773 = vmatprep.mubr.msk.f32.mxu0 %vm875_vm1, %v697_v15  ;;  %v1632_v15 = vld [vmem:[%s4491_s4 + $0x38] sm:$0xff] }
 0x221   :  { %v2964_v16 = vpack.c.bf16 %v1632_v15, %v1626_v14  ;;  %v1697_v15 = vld [vmem:[%s4491_s4 + $0x240] sm:$0xff] }
 0x222   :  { %v758_v38 = vpop.trf.xlu0  ;;  %v789_v39 = vpop.trf.xlu1 }
 0x223   :  { %2774 = vmatmul.mubr.msk.f32.gmra.mrb[38].mxu0 %vm875_vm1, %v698_v17  ;;  %v1625_v17 = vld [vmem:[%s4491_s4] sm:$0xff]  ;;  %2965 = vmatprep.subr.bf16.mxu1 %v2964_v16  ;;  %v1703_v16 = vld [vmem:[%s4491_s4 + $0x270] sm:$0xff] }
 0x224   :  { %2776 = vmatprep.mubr.msk.f32.mxu0 %vm875_vm1, %v723_v19 }
 0x226   :  { %v759_v40 = vpop.trf.xlu0  ;;  %v790_v41 = vpop.trf.xlu1 }
 0x227   :  { %2777 = vmatmul.mubr.msk.f32.gmra.mrb[40].mxu0 %vm875_vm1, %v724_v21  ;;  %v2966_v21 = vpack.c.bf16 %v1631_v18, %v1625_v17  ;;  %v2990_v18 = vpack.c.bf16 %v1703_v16, %v1697_v15 }
 0x228   :  { %2779 = vmatprep.mubr.msk.f32.mxu0 %vm875_vm1, %v725_v23 }
 0x229   :  { %2967 = vmatpush1.bf16.msra.mxu1 %v2966_v21  ;;  %v1716_v21 = vld [vmem:[%s4491_s4 + $0x2d8] sm:$0xff] }
 0x22a   :  { %v760_v42 = vpop.trf.xlu0  ;;  %v791_v44 = vpop.trf.xlu1 }
 0x22b   :  { %2780 = vmatmul.mubr.msk.f32.gmra.mrb[42].mxu0 %vm875_vm1, %v726_v25  ;;  %v1644_v25 = vld [vmem:[%s4491_s4 + $0x98] sm:$0xff] }
 0x22c   :  { %2782 = vmatprep.mubr.msk.f32.mxu0 %vm875_vm1, %v727_v27  ;;  %v2968_v27 = vpack.c.bf16 %v1644_v25, %v1638_v24  ;;  %v1709_v24 = vld [vmem:[%s4491_s4 + $0x2a0] sm:$0xff]  ;;  %v1715_v25 = vld [vmem:[%s4491_s4 + $0x2d0] sm:$0xff] }
 0x22e   :  { %v761_v43 = vpop.trf.xlu0  ;;  %v792_v46 = vpop.trf.xlu1  ;;  %2969 = vmatprep.subr.bf16.mxu1 %v2968_v27 }
 0x22f   :  { %2783 = vmatmul.mubr.msk.f32.gmra.mrb[44].mxu0 %vm875_vm1, %v728_v29  ;;  %v1643_v29 = vld [vmem:[%s4491_s4 + $0x90] sm:$0xff] }
 0x230   :  { %2785 = vmatprep.mubr.msk.f32.mxu0 %vm875_vm1, %v729_v31 }
 0x232   :  { %v762_v45 = vpop.trf.xlu0  ;;  %v793_v48 = vpop.trf.xlu1 }
 0x233   :  { %2786 = vmatmul.mubr.msk.f32.gmra.mrb[46].mxu0 %vm875_vm1, %v730_v33 }
 0x234   :  { %2788 = vmatprep.mubr.msk.f32.mxu0 %vm875_vm1, %v755_v32  ;;  %v2970_v32 = vpack.c.bf16 %v1643_v29, %v1637_v28  ;;  %v2994_v28 = vpack.c.bf16 %v1715_v25, %v1709_v24  ;;  %v1628_v29 = vld [vmem:[%s4491_s4 + $0x18] sm:$0xff] }
 0x236   :  { %v819_v47 = vpop.trf.xlu0  ;;  %v794_v50 = vpop.trf.xlu1  ;;  %2971 = vmatpush1.bf16.msra.mxu1 %v2970_v32 }
 0x237   :  { %2789 = vmatmul.mubr.msk.f32.gmra.mrb[48].mxu0 %vm875_vm1, %v756_v34  ;;  %v1650_v34 = vld [vmem:[%s4491_s4 + $0xc8] sm:$0xff] }
 0x238   :  { %2791 = vmatprep.mubr.msk.f32.mxu0 %vm875_vm1, %v757_v36 }
 0x23a   :  { %v820_v49 = vpop.trf.xlu0  ;;  %v851_v52 = vpop.trf.xlu1 }
 0x23b   :  { %2792 = vmatmul.mubr.msk.f32.gmra.mrb[50].mxu0 %vm875_vm1, %v758_v38  ;;  %v1655_v38 = vld [vmem:[%s4491_s4 + $0xf0] sm:$0xff] }
 0x23c   :  { %2794 = vmatprep.mubr.msk.f32.mxu0 %vm875_vm1, %v759_v40 }
 0x23e   :  { %v821_v51 = vpop.trf.xlu0  ;;  %v852_v54 = vpop.trf.xlu1 }
 0x23f   :  { %2795 = vmatmul.mubr.msk.f32.gmra.mrb[52].mxu0 %vm875_vm1, %v760_v42 }
 0x240   :  { %2797 = vmatprep.mubr.msk.f32.mxu0 %vm875_vm1, %v761_v43 }
 0x242   :  { %v822_v53 = vpop.trf.xlu0  ;;  %v853_v56 = vpop.trf.xlu1 }
 0x243   :  { %2798 = vmatmul.mubr.msk.f32.gmra.mrb[54].mxu0 %vm875_vm1, %v762_v45  ;;  %v1668_v45 = vld [vmem:[%s4491_s4 + $0x158] sm:$0xff] }
 0x244   :  { %2800 = vmatprep.mubr.msk.f32.mxu0 %vm875_vm1, %v787_v35  ;;  %v1656_v35 = vld [vmem:[%s4491_s4 + $0xf8] sm:$0xff] }
 0x245   :  { %v2972_v36 = vpack.c.bf16 %v1656_v35, %v1650_v34 }
 0x246   :  { %v823_v55 = vpop.trf.xlu0  ;;  %v854_v58 = vpop.trf.xlu1 }
 0x247   :  { %2801 = vmatmul.mubr.msk.f32.gmra.mrb[56].mxu0 %vm875_vm1, %v788_v37  ;;  %v1649_v37 = vld [vmem:[%s4491_s4 + $0xc0] sm:$0xff]  ;;  %2973 = vmatprep.subr.bf16.mxu1 %v2972_v36 }
 0x248   :  { %2803 = vmatprep.mubr.msk.f32.mxu0 %vm875_vm1, %v789_v39 }
 0x24a   :  { %v824_v57 = vpop.trf.xlu0  ;;  %v855_v60 = vpop.trf.xlu1 }
 0x24b   :  { %2804 = vmatmul.mubr.msk.f32.gmra.mrb[58].mxu0 %vm875_vm1, %v790_v41  ;;  %v2974_v41 = vpack.c.bf16 %v1655_v38, %v1649_v37 }
 0x24c   :  { %2806 = vmatprep.mubr.msk.f32.mxu0 %vm875_vm1, %v791_v44  ;;  %v1662_v44 = vld [vmem:[%s4491_s4 + $0x128] sm:$0xff] }
 0x24d   :  { %2975 = vmatpush1.bf16.msra.mxu1 %v2974_v41 }
 0x24e   :  { %v825_v59 = vpop.trf.xlu0  ;;  %v856_v62 = vpop.trf.xlu1 }
 0x24f   :  { %2807 = vmatmul.mubr.msk.f32.gmra.mrb[60].mxu0 %vm875_vm1, %v792_v46 }
 0x250   :  { %2809 = vmatprep.mubr.msk.f32.mxu0 %vm875_vm1, %v793_v48  ;;  %v1661_v48 = vld [vmem:[%s4491_s4 + $0x120] sm:$0xff] }
 0x252   :  { %v826_v61 = vpop.trf.xlu0  ;;  %v857_v63 = vpop.trf.xlu1 }
 0x253   :  { %2810 = vmatmul.mubr.msk.f32.gmra.mrb[62].mxu0 %vm875_vm1, %v794_v50 }
 0x254   :  { %2812 = vmatprep.mubr.msk.f32.mxu0 %vm875_vm1, %v819_v47  ;;  %v2976_v47 = vpack.c.bf16 %v1668_v45, %v1662_v44 }
 0x256   :  { %v858_v0 = vpop.trf.xlu1  ;;  %2977 = vmatprep.subr.bf16.mxu1 %v2976_v47 }
 0x257   :  { %2813 = vmatmul.mubr.msk.f32.gmra.mrb[64].mxu0 %vm875_vm1, %v820_v49  ;;  %v1667_v49 = vld [vmem:[%s4491_s4 + $0x150] sm:$0xff] }
 0x258   :  { %2815 = vmatprep.mubr.msk.f32.mxu0 %vm875_vm1, %v821_v51 }
 0x25b   :  { %2816 = vmatmul.mubr.msk.f32.gmra.mrb[66].mxu0 %vm875_vm1, %v822_v53 }
 0x25c   :  { %2818 = vmatprep.mubr.msk.f32.mxu0 %vm875_vm1, %v823_v55  ;;  %v1680_v55 = vld [vmem:[%s4491_s4 + $0x1b8] sm:$0xff] }
 0x25f   :  { %2819 = vmatmul.mubr.msk.f32.gmra.mrb[68].mxu0 %vm875_vm1, %v824_v57  ;;  %v1673_v57 = vld [vmem:[%s4491_s4 + $0x180] sm:$0xff] }
 0x260   :  { %2821 = vmatprep.mubr.msk.f32.mxu0 %vm875_vm1, %v825_v59 }
 0x263   :  { %2822 = vmatmul.mubr.msk.f32.gmra.mrb[70].mxu0 %vm875_vm1, %v826_v61 }
 0x264   :  { %2824 = vmatprep.mubr.msk.f32.mxu0 %vm875_vm1, %v851_v52  ;;  %v2978_v52 = vpack.c.bf16 %v1667_v49, %v1661_v48 }
 0x266   :  { %2979 = vmatpush1.bf16.msra.mxu1 %v2978_v52 }
 0x267   :  { %2825 = vmatmul.mubr.msk.f32.gmra.mrb[72].mxu0 %vm875_vm1, %v852_v54  ;;  %v1674_v54 = vld [vmem:[%s4491_s4 + $0x188] sm:$0xff] }
 0x268   :  { %2827 = vmatprep.mubr.msk.f32.mxu0 %vm875_vm1, %v853_v56  ;;  %v2980_v56 = vpack.c.bf16 %v1680_v55, %v1674_v54 }
 0x26a   :  { %2981 = vmatprep.subr.bf16.mxu1 %v2980_v56 }
 0x26b   :  { %2828 = vmatmul.mubr.msk.f32.gmra.mrb[74].mxu0 %vm875_vm1, %v854_v58  ;;  %v1679_v58 = vld [vmem:[%s4491_s4 + $0x1b0] sm:$0xff] }
 0x26c   :  { %2830 = vmatprep.mubr.msk.f32.mxu0 %vm875_vm1, %v855_v60  ;;  %v2982_v61 = vpack.c.bf16 %v1679_v58, %v1673_v57 }
 0x26e   :  { %2983 = vmatpush1.bf16.msra.mxu1 %v2982_v61 }
 0x26f   :  { %2831 = vmatmul.mubr.msk.f32.gmra.mrb[76].mxu0 %vm875_vm1, %v856_v62 }
 0x270   :  { %2833 = vmatprep.mubr.msk.f32.mxu0 %vm875_vm1, %v857_v63 }
 0x273   :  { %2834 = vmatmul.mubr.msk.f32.gmra.mrb[78].mxu0 %vm875_vm1, %v858_v0  ;;  %v1686_v0 = vld [vmem:[%s4491_s4 + $0x1e8] sm:$0xff] }
 0x2ae   :  { %v2742_v2 = vpop.f32.mrb[16].mxu0 }
 0x2af   :  { %v1144_v3 = vadd.f32 %v2742_v2, %v3800_v1  ;;  %v1138_v4 = vpop.f32.mrb[17].mxu0  ;;  %v1692_v2 = vld [vmem:[%s4491_s4 + $0x218] sm:$0xff] }
 0x2b0   :  { %v1139_v5 = vadd.f32 %v3800_v1, %v1138_v4 }
 0x2b1   :  { %v1458_v6 = vmax.f32 %v1144_v3, 0.0 }
 0x2b2   :  { %v1457_v7 = vmax.f32 %v1139_v5, 0.0  ;;  %v2984_v5 = vpack.c.bf16 %v1692_v2, %v1686_v0 }
 0x2b4   :  { %v1521_v8 = vadd.f32 %v1458_v6, %v1457_v7  ;;  %v1685_v6 = vld [vmem:[%s4491_s4 + $0x1e0] sm:$0xff]  ;;  %v1691_v7 = vld [vmem:[%s4491_s4 + $0x210] sm:$0xff]  ;;  %2985 = vmatprep.subr.bf16.mxu1 %v2984_v5 }
 0x2b6   :  { %v2745_v9 = vpop.f32.mrb[18].mxu0 }
 0x2b7   :  { %v1148_v10 = vpop.f32.mrb[19].mxu0  ;;  %v1154_v11 = vadd.f32 %v2745_v9, %v3800_v1  ;;  %v2986_v9 = vpack.c.bf16 %v1691_v7, %v1685_v6 }
 0x2b8   :  { %v1149_v12 = vadd.f32 %v3800_v1, %v1148_v10 }
 0x2b9   :  { %v1460_v19 = vmax.f32 %v1154_v11, 0.0  ;;  %2987 = vmatpush1.bf16.msra.mxu1 %v2986_v9 }
 0x2ba   :  { %v1459_v13 = vmax.f32 %v1149_v12, 0.0  ;;  %v1698_v12 = vld [vmem:[%s4491_s4 + $0x248] sm:$0xff] }
 0x2bc   :  { %v1522_v20 = vadd.f32 %v1521_v8, %v1459_v13  ;;  %v1704_v13 = vld [vmem:[%s4491_s4 + $0x278] sm:$0xff] }
 0x2bd   :  { %v2988_v14 = vpack.c.bf16 %v1704_v13, %v1698_v12 }
 0x2be   :  { %v2748_v22 = vpop.f32.mrb[20].mxu0  ;;  %v1523_v23 = vadd.f32 %v1522_v20, %v1460_v19  ;;  %v1710_v20 = vld [vmem:[%s4491_s4 + $0x2a8] sm:$0xff] }
 0x2bf   :  { %v1158_v26 = vpop.f32.mrb[21].mxu0  ;;  %v1164_v30 = vadd.f32 %v2748_v22, %v3800_v1  ;;  %2989 = vmatprep.subr.bf16.mxu1 %v2988_v14 }
 0x2c0   :  { %v1159_v31 = vadd.f32 %v3800_v1, %v1158_v26  ;;  %2991 = vmatpush1.bf16.msra.mxu1 %v2990_v18 }
 0x2c1   :  { %v1462_v39 = vmax.f32 %v1164_v30, 0.0  ;;  %v1634_v30 = vld [vmem:[%s4491_s4 + $0x48] sm:$0xff] }
 0x2c2   :  { %v1461_v33 = vmax.f32 %v1159_v31, 0.0  ;;  %v3262_v31 = vmov 0.0   ;;  %v2996_v32 = vpack.c.bf16 %v1634_v30, %v1628_v29 }
 0x2c3   :  { %1840 = vmatprep.mubr.f32.mxu1 %v3262_v31 }
 0x2c4   :  { %v1524_v40 = vadd.f32 %v1523_v23, %v1461_v33  ;;  %v2992_v23 = vpack.c.bf16 %v1716_v21, %v1710_v20 }
 0x2c6   :  { %v2751_v42 = vpop.f32.mrb[22].mxu0  ;;  %v1525_v43 = vadd.f32 %v1524_v40, %v1462_v39  ;;  %2993 = vmatprep.subr.bf16.mxu1 %v2992_v23 }
 0x2c7   :  { %v1168_v46 = vpop.f32.mrb[23].mxu0  ;;  %v1174_v50 = vadd.f32 %v2751_v42, %v3800_v1  ;;  %2995 = vmatpush1.bf16.msra.mxu1 %v2994_v28 }
 0x2c8   :  { %v1169_v51 = vadd.f32 %v3800_v1, %v1168_v46  ;;  %2997 = vmatprep.subr.bf16.mxu1 %v2996_v32 }
 0x2c9   :  { %v1464_v59 = vmax.f32 %v1174_v50, 0.0 }
 0x2ca   :  { %v1463_v53 = vmax.f32 %v1169_v51, 0.0 }
 0x2cc   :  { %v1526_v60 = vadd.f32 %v1525_v43, %v1463_v53 }
 0x2ce   :  { %v1527_v62 = vadd.f32 %v1526_v60, %v1464_v59  ;;  %v2754_v63 = vpop.f32.mrb[24].mxu0 }
 0x2cf   :  { %v1184_v3 = vadd.f32 %v2754_v63, %v3800_v1  ;;  %v1178_v4 = vpop.f32.mrb[25].mxu0 }
 0x2d0   :  { %v1179_v8 = vadd.f32 %v3800_v1, %v1178_v4  ;;  %v1528_v44 = vrot.slane %v1527_v62, 4 }
 0x2d1   :  { %v1466_v10 = vmax.f32 %v1184_v3, 0.0 }
 0x2d2   :  { %v1465_v11 = vmax.f32 %v1179_v8, 0.0  ;;  %v1529_v50 = vadd.f32 %v1528_v44, %v1527_v62 }
 0x2d4   :  { %v1534_v17 = vadd.f32 %v1466_v10, %v1465_v11  ;;  %v1530_v59 = vrot.slane %v1529_v50, 2 }
 0x2d6   :  { %v2757_v19 = vpop.f32.mrb[26].mxu0  ;;  %v1531_v5 = vadd.f32 %v1530_v59, %v1529_v50 }
 0x2d7   :  { %v1188_v22 = vpop.f32.mrb[27].mxu0  ;;  %v1194_v26 = vadd.f32 %v2757_v19, %v3800_v1 }
 0x2d8   :  { %v1189_v27 = vadd.f32 %v3800_v1, %v1188_v22  ;;  %v1532_v15 = vrot.slane %v1531_v5, 1 }
 0x2d9   :  { %v1468_v34 = vmax.f32 %v1194_v26, 0.0 }
 0x2da   :  { %v1467_v33 = vmax.f32 %v1189_v27, 0.0  ;;  %v1533_v26 = vadd.f32 %v1532_v15, %v1531_v5 }
 0x2dc   :  { %v1535_v35 = vadd.f32 %v1534_v17, %v1467_v33 }
 0x2de   :  { %v2760_v36 = vpop.f32.mrb[28].mxu0  ;;  %v1536_v37 = vadd.f32 %v1535_v35, %v1468_v34 }
 0x2df   :  { %v1198_v38 = vpop.f32.mrb[29].mxu0  ;;  %v1204_v39 = vadd.f32 %v2760_v36, %v3800_v1 }
 0x2e0   :  { %v1199_v40 = vadd.f32 %v3800_v1, %v1198_v38 }
 0x2e1   :  { %v1470_v42 = vmax.f32 %v1204_v39, 0.0 }
 0x2e2   :  { %v1469_v41 = vmax.f32 %v1199_v40, 0.0 }
 0x2e4   :  { %v1537_v43 = vadd.f32 %v1536_v37, %v1469_v41 }
 0x2e6   :  { %v2763_v45 = vpop.f32.mrb[30].mxu0  ;;  %v1538_v46 = vadd.f32 %v1537_v43, %v1470_v42 }
 0x2e7   :  { %v1208_v47 = vpop.f32.mrb[31].mxu0  ;;  %v1214_v48 = vadd.f32 %v2763_v45, %v3800_v1 }
 0x2e8   :  { %v1209_v49 = vadd.f32 %v3800_v1, %v1208_v47 }
 0x2e9   :  { %v1472_v55 = vmax.f32 %v1214_v48, 0.0 }
 0x2ea   :  { %v1471_v51 = vmax.f32 %v1209_v49, 0.0  ;;  %v2766_v52 = vpop.f32.mrb[32].mxu0 }
 0x2eb   :  { %v1224_v53 = vadd.f32 %v2766_v52, %v3800_v1  ;;  %v1218_v54 = vpop.f32.mrb[33].mxu0 }
 0x2ec   :  { %v1539_v56 = vadd.f32 %v1538_v46, %v1471_v51  ;;  %v1219_v57 = vadd.f32 %v3800_v1, %v1218_v54 }
 0x2ed   :  { %v1474_v58 = vmax.f32 %v1224_v53, 0.0 }
 0x2ee   :  { %v1540_v60 = vadd.f32 %v1539_v56, %v1472_v55  ;;  %v1473_v61 = vmax.f32 %v1219_v57, 0.0  ;;  %v2769_v63 = vpop.f32.mrb[34].mxu0 }
 0x2ef   :  { %v1228_v0 = vpop.f32.mrb[35].mxu0  ;;  %v1234_v4 = vadd.f32 %v2769_v63, %v3800_v1 }
 0x2f0   :  { %v1541_v2 = vrot.slane %v1540_v60, 4  ;;  %v1547_v3 = vadd.f32 %v1474_v58, %v1473_v61  ;;  %v1229_v62 = vadd.f32 %v3800_v1, %v1228_v0 }
 0x2f1   :  { %v1476_v12 = vmax.f32 %v1234_v4, 0.0 }
 0x2f2   :  { %v1542_v6 = vadd.f32 %v1541_v2, %v1540_v60  ;;  %v1475_v7 = vmax.f32 %v1229_v62, 0.0  ;;  %v2772_v8 = vpop.f32.mrb[36].mxu0 }
 0x2f3   :  { %v1244_v9 = vadd.f32 %v2772_v8, %v3800_v1  ;;  %v1238_v10 = vpop.f32.mrb[37].mxu0 }
 0x2f4   :  { %v1543_v11 = vrot.slane %v1542_v6, 2  ;;  %v1548_v13 = vadd.f32 %v1547_v3, %v1475_v7  ;;  %v1239_v14 = vadd.f32 %v3800_v1, %v1238_v10 }
 0x2f5   :  { %v1478_v20 = vmax.f32 %v1244_v9, 0.0 }
 0x2f6   :  { %v1544_v16 = vadd.f32 %v1543_v11, %v1542_v6  ;;  %v1477_v17 = vmax.f32 %v1239_v14, 0.0  ;;  %v1549_v18 = vadd.f32 %v1548_v13, %v1476_v12  ;;  %v2775_v19 = vpop.f32.mrb[38].mxu0 }
 0x2f7   :  { %v1248_v21 = vpop.f32.mrb[39].mxu0  ;;  %v1254_v24 = vadd.f32 %v2775_v19, %v3800_v1 }
 0x2f8   :  { %v1545_v22 = vrot.slane %v1544_v16, 1  ;;  %v1550_v23 = vadd.f32 %v1549_v18, %v1477_v17  ;;  %v1249_v25 = vadd.f32 %v3800_v1, %v1248_v21 }
 0x2f9   :  { %v1480_v35 = vmax.f32 %v1254_v24, 0.0 }
 0x2fa   :  { %v1546_v27 = vadd.f32 %v1545_v22, %v1544_v16  ;;  %v1479_v28 = vmax.f32 %v1249_v25, 0.0  ;;  %v1551_v29 = vadd.f32 %v1550_v23, %v1478_v20  ;;  %v2778_v30 = vpop.f32.mrb[40].mxu0 }
 0x2fb   :  { %v1264_v32 = vadd.f32 %v2778_v30, %v3800_v1  ;;  %v1258_v33 = vpop.f32.mrb[41].mxu0 }
 0x2fc   :  { %v1762_v34 = vsel %vm1761_vm2, %v1546_v27, %v1533_v26  ;;  %v1552_v36 = vadd.f32 %v1551_v29, %v1479_v28  ;;  %v1259_v37 = vadd.f32 %v3800_v1, %v1258_v33 }
 0x2fd   :  { %v1482_v38 = vmax.f32 %v1264_v32, 0.0 }
 0x2fe   :  { %v1553_v39 = vadd.f32 %v1552_v36, %v1480_v35  ;;  %v1481_v40 = vmax.f32 %v1259_v37, 0.0  ;;  %v2781_v41 = vpop.f32.mrb[42].mxu0 }
 0x2ff   :  { %v1268_v42 = vpop.f32.mrb[43].mxu0  ;;  %v1274_v45 = vadd.f32 %v2781_v41, %v3800_v1 }
 0x300   :  { %v1554_v43 = vrot.slane %v1553_v39, 4  ;;  %v1560_v44 = vadd.f32 %v1482_v38, %v1481_v40  ;;  %v1269_v46 = vadd.f32 %v3800_v1, %v1268_v42 }
 0x301   :  { %v1484_v53 = vmax.f32 %v1274_v45, 0.0 }
 0x302   :  { %v1555_v47 = vadd.f32 %v1554_v43, %v1553_v39  ;;  %v1483_v48 = vmax.f32 %v1269_v46, 0.0  ;;  %v2784_v49 = vpop.f32.mrb[44].mxu0 }
 0x303   :  { %v1284_v50 = vadd.f32 %v2784_v49, %v3800_v1  ;;  %v1278_v51 = vpop.f32.mrb[45].mxu0 }
 0x304   :  { %v1556_v52 = vrot.slane %v1555_v47, 2  ;;  %v1561_v54 = vadd.f32 %v1560_v44, %v1483_v48  ;;  %v1279_v55 = vadd.f32 %v3800_v1, %v1278_v51 }
 0x305   :  { %v1486_v60 = vmax.f32 %v1284_v50, 0.0 }
 0x306   :  { %v1557_v56 = vadd.f32 %v1556_v52, %v1555_v47  ;;  %v1485_v57 = vmax.f32 %v1279_v55, 0.0  ;;  %v1562_v58 = vadd.f32 %v1561_v54, %v1484_v53  ;;  %v2787_v59 = vpop.f32.mrb[46].mxu0  ;;  %v2043_v53 = vld [vmem:[%s4493_s6 + $0x180] sm:$0xff]  ;;  %v2044_v54 = vld [vmem:[%s4493_s6 + $0x188] sm:$0xff] }
 0x307   :  { %v1288_v61 = vpop.f32.mrb[47].mxu0  ;;  %v1294_v2 = vadd.f32 %v2787_v59, %v3800_v1  ;;  %v2027_v55 = vld [vmem:[%s4493_s6 + $0x100] sm:$0xff]  ;;  %v3092_v59 = vpack.c.bf16 %v2044_v54, %v2043_v53 }
 0x308   :  { %v1558_v63 = vrot.slane %v1557_v56, 1  ;;  %v1563_v0 = vadd.f32 %v1562_v58, %v1485_v57  ;;  %v1289_v3 = vadd.f32 %v3800_v1, %v1288_v61  ;;  %v2045_v61 = vld [vmem:[%s4493_s6 + $0x190] sm:$0xff] }
 0x309   :  { %v1488_v10 = vmax.f32 %v1294_v2, 0.0  ;;  %3093 = vmatprep.subr.bf16.mxu0 %v3092_v59 }
 0x30a   :  { %v1559_v4 = vadd.f32 %v1558_v63, %v1557_v56  ;;  %v1487_v62 = vmax.f32 %v1289_v3, 0.0  ;;  %v1564_v5 = vadd.f32 %v1563_v0, %v1486_v60  ;;  %v2790_v6 = vpop.f32.mrb[48].mxu0  ;;  %v2028_v60 = vld [vmem:[%s4493_s6 + $0x108] sm:$0xff]  ;;  %v2046_v63 = vld [vmem:[%s4493_s6 + $0x198] sm:$0xff] }
 0x30b   :  { %v1304_v7 = vadd.f32 %v2790_v6, %v3800_v1  ;;  %v1298_v8 = vpop.f32.mrb[49].mxu0  ;;  %v3094_v2 = vpack.c.bf16 %v2028_v60, %v2027_v55  ;;  %v3096_v3 = vpack.c.bf16 %v2046_v63, %v2045_v61 }
 0x30c   :  { %v1764_v9 = vsel %vm1763_vm3, %v1559_v4, %v1762_v34  ;;  %v1565_v11 = vadd.f32 %v1564_v5, %v1487_v62  ;;  %v1299_v12 = vadd.f32 %v3800_v1, %v1298_v8  ;;  %v2029_v4 = vld [vmem:[%s4493_s6 + $0x110] sm:$0xff]  ;;  %v2030_v62 = vld [vmem:[%s4493_s6 + $0x118] sm:$0xff]  ;;  %v2047_v5 = vld [vmem:[%s4493_s6 + $0x1a0] sm:$0xff] }
 0x30d   :  { %v1490_v13 = vmax.f32 %v1304_v7, 0.0  ;;  %3095 = vmatpush3.bf16.msra.mxu0 %v3094_v2 }
 0x30e   :  { %v1566_v14 = vadd.f32 %v1565_v11, %v1488_v10  ;;  %v1489_v15 = vmax.f32 %v1299_v12, 0.0  ;;  %v2793_v16 = vpop.f32.mrb[50].mxu0  ;;  %v2048_v10 = vld [vmem:[%s4493_s6 + $0x1a8] sm:$0xff]  ;;  %v3098_v11 = vpack.c.bf16 %v2030_v62, %v2029_v4  ;;  %3097 = vmatprep.subr.bf16.mxu0 %v3096_v3 }
 0x30f   :  { %v1308_v17 = vpop.f32.mrb[51].mxu0  ;;  %v1314_v20 = vadd.f32 %v2793_v16, %v3800_v1  ;;  %v2031_v16 = vld [vmem:[%s4493_s6 + $0x120] sm:$0xff] }
 0x310   :  { %v1567_v18 = vrot.slane %v1566_v14, 4  ;;  %v1573_v19 = vadd.f32 %v1490_v13, %v1489_v15  ;;  %v1309_v21 = vadd.f32 %v3800_v1, %v1308_v17  ;;  %v3100_v15 = vpack.c.bf16 %v2048_v10, %v2047_v5  ;;  %v2032_v17 = vld [vmem:[%s4493_s6 + $0x128] sm:$0xff] }
 0x311   :  { %v1492_v28 = vmax.f32 %v1314_v20, 0.0  ;;  %3099 = vmatpush3.bf16.msra.mxu0 %v3098_v11 }
 0x312   :  { %v1568_v22 = vadd.f32 %v1567_v18, %v1566_v14  ;;  %v1491_v23 = vmax.f32 %v1309_v21, 0.0  ;;  %v2796_v24 = vpop.f32.mrb[52].mxu0  ;;  %3101 = vmatprep.subr.bf16.mxu0 %v3100_v15 }
 0x313   :  { %v1324_v25 = vadd.f32 %v2796_v24, %v3800_v1  ;;  %v1318_v26 = vpop.f32.mrb[53].mxu0  ;;  %v3102_v24 = vpack.c.bf16 %v2032_v17, %v2031_v16 }
 0x314   :  { %v1569_v27 = vrot.slane %v1568_v22, 2  ;;  %v1574_v29 = vadd.f32 %v1573_v19, %v1491_v23  ;;  %v1319_v30 = vadd.f32 %v3800_v1, %v1318_v26 }
 0x315   :  { %v1494_v36 = vmax.f32 %v1324_v25, 0.0  ;;  %3103 = vmatpush3.bf16.msra.mxu0 %v3102_v24 }
 0x316   :  { %v1570_v32 = vadd.f32 %v1569_v27, %v1568_v22  ;;  %v1493_v33 = vmax.f32 %v1319_v30, 0.0  ;;  %v1575_v34 = vadd.f32 %v1574_v29, %v1492_v28  ;;  %v2799_v35 = vpop.f32.mrb[54].mxu0 }
 0x317   :  { %v1328_v37 = vpop.f32.mrb[55].mxu0  ;;  %v1334_v40 = vadd.f32 %v2799_v35, %v3800_v1 }
 0x318   :  { %v1571_v38 = vrot.slane %v1570_v32, 1  ;;  %v1576_v39 = vadd.f32 %v1575_v34, %v1493_v33  ;;  %v1329_v41 = vadd.f32 %v3800_v1, %v1328_v37  ;;  %v2049_v33 = vld [vmem:[%s4493_s6 + $0x1b0] sm:$0xff]  ;;  %v2050_v34 = vld [vmem:[%s4493_s6 + $0x1b8] sm:$0xff] }
 0x319   :  { %v1496_v48 = vmax.f32 %v1334_v40, 0.0 }
 0x31a   :  { %v1572_v42 = vadd.f32 %v1571_v38, %v1570_v32  ;;  %v1495_v43 = vmax.f32 %v1329_v41, 0.0  ;;  %v1577_v44 = vadd.f32 %v1576_v39, %v1494_v36  ;;  %v2802_v45 = vpop.f32.mrb[56].mxu0  ;;  %v3104_v38 = vpack.c.bf16 %v2050_v34, %v2049_v33 }
 0x31b   :  { %v1344_v46 = vadd.f32 %v2802_v45, %v3800_v1  ;;  %v1338_v47 = vpop.f32.mrb[57].mxu0 }
 0x31c   :  { %v1578_v49 = vadd.f32 %v1577_v44, %v1495_v43  ;;  %v1339_v50 = vadd.f32 %v3800_v1, %v1338_v47  ;;  %v3947_v51 = vsel %vm1765_vm4, %v1572_v42, %v1764_v9  ;;  %3105 = vmatprep.subr.bf16.mxu0 %v3104_v38  ;;  %v2033_v43 = vld [vmem:[%s4493_s6 + $0x130] sm:$0xff]  ;;  %v2034_v44 = vld [vmem:[%s4493_s6 + $0x138] sm:$0xff] }
 0x31d   :  { %v1498_v52 = vmax.f32 %v1344_v46, 0.0  ;;  %v3106_v47 = vpack.c.bf16 %v2034_v44, %v2033_v43 }
 0x31e   :  { %v1579_v56 = vadd.f32 %v1578_v49, %v1496_v48  ;;  %v1497_v57 = vmax.f32 %v1339_v50, 0.0  ;;  %v2805_v58 = vpop.f32.mrb[58].mxu0 }
 0x31f   :  { %v1348_v0 = vpop.f32.mrb[59].mxu0  ;;  %v1354_v8 = vadd.f32 %v2805_v58, %v3800_v1  ;;  %3107 = vmatpush3.bf16.msra.mxu0 %v3106_v47 }
 0x320   :  { %v1580_v6 = vrot.slane %v1579_v56, 4  ;;  %v1586_v7 = vadd.f32 %v1498_v52, %v1497_v57  ;;  %v1349_v9 = vadd.f32 %v3800_v1, %v1348_v0 }
 0x321   :  { %v1500_v21 = vmax.f32 %v1354_v8, 0.0 }
 0x322   :  { %v1581_v12 = vadd.f32 %v1580_v6, %v1579_v56  ;;  %v1499_v13 = vmax.f32 %v1349_v9, 0.0  ;;  %v2808_v14 = vpop.f32.mrb[60].mxu0 }
 0x323   :  { %v1364_v18 = vadd.f32 %v2808_v14, %v3800_v1  ;;  %v1358_v19 = vpop.f32.mrb[61].mxu0 }
 0x324   :  { %v1582_v20 = vrot.slane %v1581_v12, 2  ;;  %v1587_v22 = vadd.f32 %v1586_v7, %v1499_v13  ;;  %v1359_v23 = vadd.f32 %v3800_v1, %v1358_v19 }
 0x325   :  { %v1502_v29 = vmax.f32 %v1364_v18, 0.0 }
 0x326   :  { %v1583_v25 = vadd.f32 %v1582_v20, %v1581_v12  ;;  %v1501_v26 = vmax.f32 %v1359_v23, 0.0  ;;  %v1588_v27 = vadd.f32 %v1587_v22, %v1500_v21  ;;  %v2811_v28 = vpop.f32.mrb[62].mxu0 }
 0x327   :  { %v1374_v30 = vadd.f32 %v2811_v28, %v3800_v1  ;;  %v1368_v32 = vpop.f32.mrb[63].mxu0 }
 0x328   :  { %v1584_v35 = vrot.slane %v1583_v25, 1  ;;  %v1589_v36 = vadd.f32 %v1588_v27, %v1501_v26  ;;  %v1369_v37 = vadd.f32 %v3800_v1, %v1368_v32 }
 0x329   :  { %v1504_v48 = vmax.f32 %v1374_v30, 0.0 }
 0x32a   :  { %v1585_v39 = vadd.f32 %v1584_v35, %v1583_v25  ;;  %v1503_v40 = vmax.f32 %v1369_v37, 0.0  ;;  %v1590_v41 = vadd.f32 %v1589_v36, %v1502_v29  ;;  %v2814_v42 = vpop.f32.mrb[64].mxu0 }
 0x32b   :  { %v1384_v45 = vadd.f32 %v2814_v42, %v3800_v1  ;;  %v1378_v46 = vpop.f32.mrb[65].mxu0 }
 0x32c   :  { %v1591_v49 = vadd.f32 %v1590_v41, %v1503_v40  ;;  %v1379_v50 = vadd.f32 %v3800_v1, %v1378_v46  ;;  %v1768_v52 = vsel %vm1767_vm5, %v1585_v39, %v3947_v51 }
 0x32d   :  { %v1506_v53 = vmax.f32 %v1384_v45, 0.0 }
 0x32e   :  { %v1592_v54 = vadd.f32 %v1591_v49, %v1504_v48  ;;  %v1505_v55 = vmax.f32 %v1379_v50, 0.0  ;;  %v2817_v56 = vpop.f32.mrb[66].mxu0 }
 0x32f   :  { %v1388_v57 = vpop.f32.mrb[67].mxu0  ;;  %v1394_v60 = vadd.f32 %v2817_v56, %v3800_v1 }
 0x330   :  { %v1593_v58 = vrot.slane %v1592_v54, 4  ;;  %v1599_v59 = vadd.f32 %v1506_v53, %v1505_v55  ;;  %v1389_v61 = vadd.f32 %v3800_v1, %v1388_v57 }
 0x331   :  { %v1508_v51 = vmax.f32 %v1394_v60, 0.0 }
 0x332   :  { %v1594_v63 = vadd.f32 %v1593_v58, %v1592_v54  ;;  %v1507_v0 = vmax.f32 %v1389_v61, 0.0  ;;  %v2820_v2 = vpop.f32.mrb[68].mxu0 }
 0x333   :  { %v1404_v3 = vadd.f32 %v2820_v2, %v3800_v1  ;;  %v1398_v4 = vpop.f32.mrb[69].mxu0 }
 0x334   :  { %v1595_v62 = vrot.slane %v1594_v63, 2  ;;  %v1600_v5 = vadd.f32 %v1599_v59, %v1507_v0  ;;  %v1399_v6 = vadd.f32 %v3800_v1, %v1398_v4 }
 0x335   :  { %v1510_v11 = vmax.f32 %v1404_v3, 0.0 }
 0x336   :  { %v1596_v7 = vadd.f32 %v1595_v62, %v1594_v63  ;;  %v1509_v8 = vmax.f32 %v1399_v6, 0.0  ;;  %v1601_v9 = vadd.f32 %v1600_v5, %v1508_v51  ;;  %v2823_v10 = vpop.f32.mrb[70].mxu0  ;;  %v1627_v51 = vld [vmem:[%s4491_s4 + $0x10] sm:$0xff]  ;;  %v1640_v6 = vld [vmem:[%s4491_s4 + $0x78] sm:$0xff] }
 0x337   :  { %v1408_v12 = vpop.f32.mrb[71].mxu0  ;;  %v1414_v15 = vadd.f32 %v2823_v10, %v3800_v1 }
 0x338   :  { %v1597_v13 = vrot.slane %v1596_v7, 1  ;;  %v1602_v14 = vadd.f32 %v1601_v9, %v1509_v8  ;;  %v1409_v16 = vadd.f32 %v3800_v1, %v1408_v12  ;;  %v1645_v12 = vld [vmem:[%s4491_s4 + $0xa0] sm:$0xff] }
 0x339   :  { %v1512_v23 = vmax.f32 %v1414_v15, 0.0  ;;  %v1658_v15 = vld [vmem:[%s4491_s4 + $0x108] sm:$0xff] }
 0x33a   :  { %v1598_v17 = vadd.f32 %v1597_v13, %v1596_v7  ;;  %v1511_v18 = vmax.f32 %v1409_v16, 0.0  ;;  %v1603_v19 = vadd.f32 %v1602_v14, %v1510_v11  ;;  %v2826_v20 = vpop.f32.mrb[72].mxu0  ;;  %v1646_v7 = vld [vmem:[%s4491_s4 + $0xa8] sm:$0xff]  ;;  %v1639_v11 = vld [vmem:[%s4491_s4 + $0x70] sm:$0xff]  ;;  %v1652_v14 = vld [vmem:[%s4491_s4 + $0xd8] sm:$0xff] }
 0x33b   :  { %v1424_v21 = vadd.f32 %v2826_v20, %v3800_v1  ;;  %v1418_v22 = vpop.f32.mrb[73].mxu0  ;;  %v3000_v10 = vpack.c.bf16 %v1646_v7, %v1640_v6  ;;  %v3002_v16 = vpack.c.bf16 %v1645_v12, %v1639_v11  ;;  %v1664_v20 = vld [vmem:[%s4491_s4 + $0x138] sm:$0xff] }
 0x33c   :  { %v1604_v24 = vadd.f32 %v1603_v19, %v1511_v18  ;;  %v1419_v25 = vadd.f32 %v3800_v1, %v1418_v22  ;;  %v1770_v26 = vsel %vm1769_vm6, %v1598_v17, %v1768_v52  ;;  %v3004_v17 = vpack.c.bf16 %v1658_v15, %v1652_v14  ;;  %v1651_v18 = vld [vmem:[%s4491_s4 + $0xd0] sm:$0xff]  ;;  %v1657_v19 = vld [vmem:[%s4491_s4 + $0x100] sm:$0xff]  ;;  %v1672_v6 = vld [vmem:[%s4491_s4 + $0x178] sm:$0xff] }
 0x33d   :  { %v1514_v27 = vmax.f32 %v1424_v21, 0.0  ;;  %v1670_v21 = vld [vmem:[%s4491_s4 + $0x168] sm:$0xff]  ;;  %v3006_v22 = vpack.c.bf16 %v1657_v19, %v1651_v18  ;;  %v1684_v11 = vld [vmem:[%s4491_s4 + $0x1d8] sm:$0xff]  ;;  %v1677_v15 = vld [vmem:[%s4491_s4 + $0x1a0] sm:$0xff] }
 0x33e   :  { %v1605_v28 = vadd.f32 %v1604_v24, %v1512_v23  ;;  %v1513_v29 = vmax.f32 %v1419_v25, 0.0  ;;  %v2829_v30 = vpop.f32.mrb[74].mxu0  ;;  %v3008_v23 = vpack.c.bf16 %v1670_v21, %v1664_v20  ;;  %v1663_v24 = vld [vmem:[%s4491_s4 + $0x130] sm:$0xff]  ;;  %v1669_v25 = vld [vmem:[%s4491_s4 + $0x160] sm:$0xff]  ;;  %v1696_v18 = vld [vmem:[%s4491_s4 + $0x238] sm:$0xff] }
 0x33f   :  { %v1428_v32 = vpop.f32.mrb[75].mxu0  ;;  %v1434_v35 = vadd.f32 %v2829_v30, %v3800_v1  ;;  %v1675_v30 = vld [vmem:[%s4491_s4 + $0x190] sm:$0xff]  ;;  %v1689_v21 = vld [vmem:[%s4491_s4 + $0x200] sm:$0xff] }
 0x340   :  { %v1606_v33 = vrot.slane %v1605_v28, 4  ;;  %v1612_v34 = vadd.f32 %v1514_v27, %v1513_v29  ;;  %v1429_v36 = vadd.f32 %v3800_v1, %v1428_v32  ;;  %v1682_v27 = vld [vmem:[%s4491_s4 + $0x1c8] sm:$0xff]  ;;  %v1681_v32 = vld [vmem:[%s4491_s4 + $0x1c0] sm:$0xff] }
 0x341   :  { %v1516_v43 = vmax.f32 %v1434_v35, 0.0  ;;  %v3014_v35 = vpack.c.bf16 %v1681_v32, %v1675_v30  ;;  %v1720_v30 = vld [vmem:[%s4491_s4 + $0x2f8] sm:$0xff] }
 0x342   :  { %v1607_v37 = vadd.f32 %v1606_v33, %v1605_v28  ;;  %v1515_v38 = vmax.f32 %v1429_v36, 0.0  ;;  %v2832_v39 = vpop.f32.mrb[76].mxu0  ;;  %v3010_v28 = vpack.c.bf16 %v1669_v25, %v1663_v24  ;;  %v1688_v33 = vld [vmem:[%s4491_s4 + $0x1f8] sm:$0xff] }
 0x343   :  { %v1444_v40 = vadd.f32 %v2832_v39, %v3800_v1  ;;  %v1438_v41 = vpop.f32.mrb[77].mxu0  ;;  %v1700_v39 = vld [vmem:[%s4491_s4 + $0x258] sm:$0xff] }
 0x344   :  { %v1608_v42 = vrot.slane %v1607_v37, 2  ;;  %v1613_v44 = vadd.f32 %v1612_v34, %v1515_v38  ;;  %v1439_v45 = vadd.f32 %v3800_v1, %v1438_v41  ;;  %v1694_v34 = vld [vmem:[%s4491_s4 + $0x228] sm:$0xff]  ;;  %v1693_v38 = vld [vmem:[%s4491_s4 + $0x220] sm:$0xff]  ;;  %v1708_v24 = vld [vmem:[%s4491_s4 + $0x298] sm:$0xff] }
 0x345   :  { %v1518_v50 = vmax.f32 %v1444_v40, 0.0  ;;  %v3016_v36 = vpack.c.bf16 %v1694_v34, %v1688_v33  ;;  %v1706_v40 = vld [vmem:[%s4491_s4 + $0x288] sm:$0xff]  ;;  %v1713_v34 = vld [vmem:[%s4491_s4 + $0x2c0] sm:$0xff] }
 0x346   :  { %v1609_v46 = vadd.f32 %v1608_v42, %v1607_v37  ;;  %v1517_v47 = vmax.f32 %v1439_v45, 0.0  ;;  %v1614_v48 = vadd.f32 %v1613_v44, %v1516_v43  ;;  %v2835_v49 = vpop.f32.mrb[78].mxu0  ;;  %v1687_v37 = vld [vmem:[%s4491_s4 + $0x1f0] sm:$0xff]  ;;  %v3020_v42 = vpack.c.bf16 %v1706_v40, %v1700_v39  ;;  %v1705_v44 = vld [vmem:[%s4491_s4 + $0x280] sm:$0xff]  ;;  %v1712_v45 = vld [vmem:[%s4491_s4 + $0x2b8] sm:$0xff] }
 0x347   :  { %v1448_v52 = vpop.f32.mrb[79].mxu0  ;;  %v1454_v55 = vadd.f32 %v2835_v49, %v3800_v1  ;;  %v3018_v41 = vpack.c.bf16 %v1693_v38, %v1687_v37  ;;  %v1699_v43 = vld [vmem:[%s4491_s4 + $0x250] sm:$0xff]  ;;  %v2012_v37 = vld [vmem:[%s4493_s6 + $0x88] sm:$0xff]  ;;  %v1995_v40 = vld [vmem:[%s4493_s6] sm:$0xff] }
 0x348   :  { %v1610_v53 = vrot.slane %v1609_v46, 1  ;;  %v1615_v54 = vadd.f32 %v1614_v48, %v1517_v47  ;;  %v1449_v56 = vadd.f32 %v3800_v1, %v1448_v52  ;;  %v1633_v1 = vld [vmem:[%s4491_s4 + $0x40] sm:$0xff]  ;;  %v3022_v47 = vpack.c.bf16 %v1705_v44, %v1699_v43  ;;  %v1711_v49 = vld [vmem:[%s4491_s4 + $0x2b0] sm:$0xff]  ;;  %v1630_v52 = vld [vmem:[%s4491_s4 + $0x28] sm:$0xff] }
 0x349   :  { %v1520_v60 = vmax.f32 %v1454_v55, 0.0  ;;  %v2998_v9 = vpack.c.bf16 %v1633_v1, %v1627_v51  ;;  %v1653_v51 = vld [vmem:[%s4491_s4 + $0xe0] sm:$0xff]  ;;  %v1659_v1 = vld [vmem:[%s4491_s4 + $0x110] sm:$0xff]  ;;  %v2014_v43 = vld [vmem:[%s4493_s6 + $0x98] sm:$0xff] }
 0x34a   :  { %v1611_v57 = vadd.f32 %v1610_v53, %v1609_v46  ;;  %v1519_v58 = vmax.f32 %v1449_v56, 0.0  ;;  %v1616_v59 = vadd.f32 %v1615_v54, %v1518_v50  ;;  %v1718_v46 = vld [vmem:[%s4491_s4 + $0x2e8] sm:$0xff]  ;;  %v1717_v50 = vld [vmem:[%s4491_s4 + $0x2e0] sm:$0xff]  ;;  %v1636_v53 = vld [vmem:[%s4491_s4 + $0x58] sm:$0xff] }
 0x34b   :  { %v3024_v48 = vpack.c.bf16 %v1718_v46, %v1712_v45  ;;  %v3026_v54 = vpack.c.bf16 %v1717_v50, %v1711_v49  ;;  %v3028_v55 = vpack.c.bf16 %v1636_v53, %v1630_v52  ;;  %v1629_v56 = vld [vmem:[%s4491_s4 + $0x20] sm:$0xff]  ;;  %v1997_v46 = vld [vmem:[%s4493_s6 + $0x10] sm:$0xff]  ;;  %v2016_v49 = vld [vmem:[%s4493_s6 + $0xa8] sm:$0xff] }
 0x34c   :  { %v1617_v61 = vadd.f32 %v1616_v59, %v1519_v58  ;;  %v1772_v63 = vsel %vm1771_vm7, %v1611_v57, %v1770_v26  ;;  %v1676_v26 = vld [vmem:[%s4491_s4 + $0x198] sm:$0xff]  ;;  %v1635_v57 = vld [vmem:[%s4491_s4 + $0x50] sm:$0xff]  ;;  %v1642_v58 = vld [vmem:[%s4491_s4 + $0x88] sm:$0xff] }
 0x34d   :  { %v3012_v29 = vpack.c.bf16 %v1682_v27, %v1676_v26  ;;  %v1648_v59 = vld [vmem:[%s4491_s4 + $0xb8] sm:$0xff]  ;;  %v1701_v27 = vld [vmem:[%s4491_s4 + $0x260] sm:$0xff] }
 0x34e   :  { %v1618_v0 = vadd.f32 %v1617_v61, %v1520_v60  ;;  %v3030_v60 = vpack.c.bf16 %v1635_v57, %v1629_v56  ;;  %v3032_v61 = vpack.c.bf16 %v1648_v59, %v1642_v58  ;;  %v1999_v53 = vld [vmem:[%s4493_s6 + $0x20] sm:$0xff]  ;;  %v2001_v58 = vld [vmem:[%s4493_s6 + $0x30] sm:$0xff]  ;;  %v2002_v59 = vld [vmem:[%s4493_s6 + $0x38] sm:$0xff] }
 0x350   :  { %v1619_v2 = vrot.slane %v1618_v0, 4 }
 0x352   :  { %v1620_v3 = vadd.f32 %v1619_v2, %v1618_v0  ;;  %v1647_v0 = vld [vmem:[%s4491_s4 + $0xb0] sm:$0xff]  ;;  %v1654_v2 = vld [vmem:[%s4491_s4 + $0xe8] sm:$0xff] }
 0x354   :  { %v1621_v4 = vrot.slane %v1620_v3, 2 }
 0x356   :  { %v1622_v62 = vadd.f32 %v1621_v4, %v1620_v3  ;;  %v1660_v3 = vld [vmem:[%s4491_s4 + $0x118] sm:$0xff] }
 0x358   :  { %v1623_v5 = vrot.slane %v1622_v62, 1 }
 0x35a   :  { %v1624_v8 = vadd.f32 %v1623_v5, %v1622_v62  ;;  %v3036_v62 = vpack.c.bf16 %v1660_v3, %v1654_v2  ;;  %v1666_v5 = vld [vmem:[%s4491_s4 + $0x148] sm:$0xff]  ;;  %v2003_v2 = vld [vmem:[%s4493_s6 + $0x40] sm:$0xff] }
 0x35b   :  { %v3040_v7 = vpack.c.bf16 %v1672_v6, %v1666_v5  ;;  %v2004_v3 = vld [vmem:[%s4493_s6 + $0x48] sm:$0xff]  ;;  %v2005_v5 = vld [vmem:[%s4493_s6 + $0x50] sm:$0xff]  ;;  %v2006_v6 = vld [vmem:[%s4493_s6 + $0x58] sm:$0xff] }
 0x35c   :  { %v4038_v13 = vsel %vm1773_vm8, %v1624_v8, %v1772_v63  ;;  %v1641_v63 = vld [vmem:[%s4491_s4 + $0x80] sm:$0xff] }
 0x35d   :  { %1841 = vmatmul.mubr.f32.vlgmr.msra.gmra.mrb[16].mxu1 %v4038_v13  ;;  %v3034_v4 = vpack.c.bf16 %v1647_v0, %v1641_v63  ;;  %v1665_v8 = vld [vmem:[%s4491_s4 + $0x140] sm:$0xff]  ;;  %v3074_v63 = vpack.c.bf16 %v2002_v59, %v2001_v58  ;;  %v2060_v59 = vld [vmem:[%s4493_s6 + $0x208] sm:$0xff] }
 0x35e   :  { %2999 = vmatpush1.bf16.msra.mxu1 %v2998_v9  ;;  %1911 = vmatprep.mubr.f32.mxu1 %v3262_v31  ;;  %v1671_v9 = vld [vmem:[%s4491_s4 + $0x170] sm:$0xff]  ;;  %v2059_v58 = vld [vmem:[%s4493_s6 + $0x200] sm:$0xff] }
 0x35f   :  { %3001 = vmatprep.subr.bf16.mxu1 %v3000_v10  ;;  %v1678_v10 = vld [vmem:[%s4491_s4 + $0x1a8] sm:$0xff]  ;;  %v3042_v12 = vpack.c.bf16 %v1671_v9, %v1665_v8  ;;  %v3082_v8 = vpack.c.bf16 %v2006_v6, %v2005_v5 }
 0x360   :  { %v3044_v14 = vpack.c.bf16 %v1684_v11, %v1678_v10  ;;  %v2007_v10 = vld [vmem:[%s4493_s6 + $0x60] sm:$0xff]  ;;  %v2008_v11 = vld [vmem:[%s4493_s6 + $0x68] sm:$0xff] }
 0x361   :  { %v2080_v5 = vld [vmem:[%s4493_s6 + $0x2a8] sm:$0xff] }
 0x362   :  { %3003 = vmatpush1.bf16.msra.mxu1 %v3002_v16  ;;  %v1683_v16 = vld [vmem:[%s4491_s4 + $0x1d0] sm:$0xff] }
 0x363   :  { %3005 = vmatprep.subr.bf16.mxu1 %v3004_v17  ;;  %v1690_v17 = vld [vmem:[%s4491_s4 + $0x208] sm:$0xff]  ;;  %v3046_v19 = vpack.c.bf16 %v1683_v16, %v1677_v15  ;;  %v3086_v15 = vpack.c.bf16 %v2008_v11, %v2007_v10  ;;  %v2082_v10 = vld [vmem:[%s4493_s6 + $0x2b8] sm:$0xff] }
 0x364   :  { %v3048_v20 = vpack.c.bf16 %v1696_v18, %v1690_v17  ;;  %v2009_v17 = vld [vmem:[%s4493_s6 + $0x70] sm:$0xff]  ;;  %v2010_v18 = vld [vmem:[%s4493_s6 + $0x78] sm:$0xff] }
 0x366   :  { %3007 = vmatpush1.bf16.msra.mxu1 %v3006_v22  ;;  %v1695_v22 = vld [vmem:[%s4491_s4 + $0x230] sm:$0xff] }
 0x367   :  { %3009 = vmatprep.subr.bf16.mxu1 %v3008_v23  ;;  %v1702_v23 = vld [vmem:[%s4491_s4 + $0x268] sm:$0xff]  ;;  %v3050_v25 = vpack.c.bf16 %v1695_v22, %v1689_v21  ;;  %v2035_v21 = vld [vmem:[%s4493_s6 + $0x140] sm:$0xff] }
 0x368   :  { %v3052_v26 = vpack.c.bf16 %v1708_v24, %v1702_v23  ;;  %v2036_v23 = vld [vmem:[%s4493_s6 + $0x148] sm:$0xff]  ;;  %v3090_v24 = vpack.c.bf16 %v2010_v18, %v2009_v17 }
 0x369   :  { %v2084_v17 = vld [vmem:[%s4493_s6 + $0x2c8] sm:$0xff] }
 0x36a   :  { %3011 = vmatpush1.bf16.msra.mxu1 %v3010_v28  ;;  %v1707_v28 = vld [vmem:[%s4491_s4 + $0x290] sm:$0xff] }
 0x36b   :  { %3013 = vmatprep.subr.bf16.mxu1 %v3012_v29  ;;  %v1714_v29 = vld [vmem:[%s4491_s4 + $0x2c8] sm:$0xff]  ;;  %v3054_v32 = vpack.c.bf16 %v1707_v28, %v1701_v27  ;;  %v2054_v27 = vld [vmem:[%s4493_s6 + $0x1d8] sm:$0xff]  ;;  %v2037_v28 = vld [vmem:[%s4493_s6 + $0x150] sm:$0xff] }
 0x36c   :  { %v3056_v33 = vpack.c.bf16 %v1720_v30, %v1714_v29  ;;  %v2038_v30 = vld [vmem:[%s4493_s6 + $0x158] sm:$0xff] }
 0x36e   :  { %3015 = vmatpush1.bf16.msra.mxu1 %v3014_v35  ;;  %v1719_v35 = vld [vmem:[%s4491_s4 + $0x2f0] sm:$0xff] }
 0x36f   :  { %3017 = vmatprep.subr.bf16.mxu1 %v3016_v36  ;;  %v2011_v36 = vld [vmem:[%s4493_s6 + $0x80] sm:$0xff]  ;;  %v3058_v38 = vpack.c.bf16 %v1719_v35, %v1713_v34  ;;  %v3114_v34 = vpack.c.bf16 %v2038_v30, %v2037_v28 }
 0x370   :  { %v3060_v39 = vpack.c.bf16 %v2012_v37, %v2011_v36  ;;  %v2039_v36 = vld [vmem:[%s4493_s6 + $0x160] sm:$0xff]  ;;  %v2040_v37 = vld [vmem:[%s4493_s6 + $0x168] sm:$0xff] }
 0x371   :  { %v2087_v28 = vld [vmem:[%s4493_s6 + $0x2e0] sm:$0xff] }
 0x372   :  { %3019 = vmatpush1.bf16.msra.mxu1 %v3018_v41  ;;  %v1996_v41 = vld [vmem:[%s4493_s6 + $0x8] sm:$0xff] }
 0x373   :  { %3021 = vmatprep.subr.bf16.mxu1 %v3020_v42  ;;  %v2013_v42 = vld [vmem:[%s4493_s6 + $0x90] sm:$0xff]  ;;  %v3062_v44 = vpack.c.bf16 %v1996_v41, %v1995_v40  ;;  %v2058_v40 = vld [vmem:[%s4493_s6 + $0x1f8] sm:$0xff] }
 0x374   :  { %v3064_v45 = vpack.c.bf16 %v2014_v43, %v2013_v42  ;;  %v2041_v42 = vld [vmem:[%s4493_s6 + $0x170] sm:$0xff]  ;;  %v2042_v43 = vld [vmem:[%s4493_s6 + $0x178] sm:$0xff] }
 0x376   :  { %3023 = vmatpush1.bf16.msra.mxu1 %v3022_v47  ;;  %v1998_v47 = vld [vmem:[%s4493_s6 + $0x18] sm:$0xff] }
 0x377   :  { %3025 = vmatprep.subr.bf16.mxu1 %v3024_v48  ;;  %v2015_v48 = vld [vmem:[%s4493_s6 + $0xa0] sm:$0xff]  ;;  %v3066_v50 = vpack.c.bf16 %v1998_v47, %v1997_v46  ;;  %v2076_v46 = vld [vmem:[%s4493_s6 + $0x288] sm:$0xff] }
 0x378   :  { %v3068_v52 = vpack.c.bf16 %v2016_v49, %v2015_v48  ;;  %v1723_v48 = vlaneseq }
 0x37a   :  { %3027 = vmatpush1.bf16.msra.mxu1 %v3026_v54  ;;  %v2000_v54 = vld [vmem:[%s4493_s6 + $0x28] sm:$0xff]  ;;  %v4363_v49 = vshrl.u32 %v1723_v48, 7 }
 0x37b   :  { %3029 = vmatprep.subr.bf16.mxu1 %v3028_v55  ;;  %v2017_v55 = vld [vmem:[%s4493_s6 + $0xb0] sm:$0xff]  ;;  %v3070_v56 = vpack.c.bf16 %v2000_v54, %v1999_v53 }
 0x37c   :  { %v1729_v53 = vsub.s32 1, %v4363_v49 }
 0x37d   :  { %1912 = vmatmul.mubr.f32.vlgmr.msra.gmra.mrb[18].mxu1 %v4038_v13 }
 0x37e   :  { %3031 = vmatpush1.bf16.msra.mxu1 %v3030_v60  ;;  %1982 = vmatprep.mubr.f32.mxu1 %v3262_v31  ;;  %v3038_v31 = vpack.c.bf16 %v1659_v1, %v1653_v51  ;;  %v2019_v60 = vld [vmem:[%s4493_s6 + $0xc0] sm:$0xff]  ;;  %v3078_v51 = vpack.c.bf16 %v2004_v3, %v2003_v2  ;;  %v3126_v2 = vpack.c.bf16 %v2060_v59, %v2059_v58 }
 0x37f   :  { %3033 = vmatprep.subr.bf16.mxu1 %v3032_v61  ;;  %v2020_v61 = vld [vmem:[%s4493_s6 + $0xc8] sm:$0xff] }
 0x380   :  { %v3076_v0 = vpack.c.bf16 %v2020_v61, %v2019_v60  ;;  %v2077_v61 = vld [vmem:[%s4493_s6 + $0x290] sm:$0xff] }
 0x382   :  { %3035 = vmatpush1.bf16.msra.mxu1 %v3034_v4  ;;  %v2021_v4 = vld [vmem:[%s4493_s6 + $0xd0] sm:$0xff] }
 0x383   :  { %3037 = vmatprep.subr.bf16.mxu1 %v3036_v62  ;;  %v2022_v62 = vld [vmem:[%s4493_s6 + $0xd8] sm:$0xff] }
 0x384   :  { %v3080_v1 = vpack.c.bf16 %v2022_v62, %v2021_v4  ;;  %v2061_v62 = vld [vmem:[%s4493_s6 + $0x210] sm:$0xff] }
 0x386   :  { %3039 = vmatpush1.bf16.msra.mxu1 %v3038_v31  ;;  %v2023_v31 = vld [vmem:[%s4493_s6 + $0xe0] sm:$0xff] }
 0x387   :  { %3041 = vmatprep.subr.bf16.mxu1 %v3040_v7  ;;  %v2024_v7 = vld [vmem:[%s4493_s6 + $0xe8] sm:$0xff] }
 0x388   :  { %v3084_v9 = vpack.c.bf16 %v2024_v7, %v2023_v31  ;;  %v2063_v7 = vld [vmem:[%s4493_s6 + $0x220] sm:$0xff] }
 0x38a   :  { %3043 = vmatpush1.bf16.msra.mxu1 %v3042_v12  ;;  %v2025_v12 = vld [vmem:[%s4493_s6 + $0xf0] sm:$0xff] }
 0x38b   :  { %3045 = vmatprep.subr.bf16.mxu1 %v3044_v14  ;;  %v2026_v14 = vld [vmem:[%s4493_s6 + $0xf8] sm:$0xff] }
 0x38c   :  { %v3088_v16 = vpack.c.bf16 %v2026_v14, %v2025_v12  ;;  %v2065_v14 = vld [vmem:[%s4493_s6 + $0x230] sm:$0xff] }
 0x38e   :  { %3047 = vmatpush1.bf16.msra.mxu1 %v3046_v19  ;;  %v2051_v19 = vld [vmem:[%s4493_s6 + $0x1c0] sm:$0xff] }
 0x38f   :  { %3049 = vmatprep.subr.bf16.mxu1 %v3048_v20  ;;  %v2052_v20 = vld [vmem:[%s4493_s6 + $0x1c8] sm:$0xff] }
 0x390   :  { %v3108_v22 = vpack.c.bf16 %v2052_v20, %v2051_v19  ;;  %v2067_v20 = vld [vmem:[%s4493_s6 + $0x240] sm:$0xff] }
 0x392   :  { %3051 = vmatpush1.bf16.msra.mxu1 %v3050_v25  ;;  %v3110_v25 = vpack.c.bf16 %v2036_v23, %v2035_v21  ;;  %3109 = vmatprep.subr.bf16.mxu0 %v3108_v22  ;;  %v2068_v21 = vld [vmem:[%s4493_s6 + $0x248] sm:$0xff]  ;;  %v2085_v22 = vld [vmem:[%s4493_s6 + $0x2d0] sm:$0xff]  ;;  %v2086_v23 = vld [vmem:[%s4493_s6 + $0x2d8] sm:$0xff] }
 0x393   :  { %3053 = vmatprep.subr.bf16.mxu1 %v3052_v26  ;;  %v2053_v26 = vld [vmem:[%s4493_s6 + $0x1d0] sm:$0xff] }
 0x394   :  { %3111 = vmatpush3.bf16.msra.mxu0 %v3110_v25  ;;  %v3112_v29 = vpack.c.bf16 %v2054_v27, %v2053_v26  ;;  %v3144_v25 = vpack.c.bf16 %v2086_v23, %v2085_v22  ;;  %v2069_v26 = vld [vmem:[%s4493_s6 + $0x250] sm:$0xff]  ;;  %v2070_v27 = vld [vmem:[%s4493_s6 + $0x258] sm:$0xff] }
 0x395   :  { %v3146_v30 = vpack.c.bf16 %v2070_v27, %v2069_v26 }
 0x396   :  { %3055 = vmatpush1.bf16.msra.mxu1 %v3054_v32  ;;  %v2055_v32 = vld [vmem:[%s4493_s6 + $0x1e0] sm:$0xff]  ;;  %3113 = vmatprep.subr.bf16.mxu0 %v3112_v29  ;;  %v2088_v29 = vld [vmem:[%s4493_s6 + $0x2e8] sm:$0xff] }
 0x397   :  { %3057 = vmatprep.subr.bf16.mxu1 %v3056_v33  ;;  %v2056_v33 = vld [vmem:[%s4493_s6 + $0x1e8] sm:$0xff] }
 0x398   :  { %v3116_v35 = vpack.c.bf16 %v2056_v33, %v2055_v32  ;;  %3115 = vmatpush3.bf16.msra.mxu0 %v3114_v34  ;;  %v1733_v32 = vsub.s32 2, %v4363_v49  ;;  %v3148_v33 = vpack.c.bf16 %v2088_v29, %v2087_v28  ;;  %v2071_v34 = vld [vmem:[%s4493_s6 + $0x260] sm:$0xff] }
 0x39a   :  { %3059 = vmatpush1.bf16.msra.mxu1 %v3058_v38  ;;  %3117 = vmatprep.subr.bf16.mxu0 %v3116_v35  ;;  %v3118_v38 = vpack.c.bf16 %v2040_v37, %v2039_v36  ;;  %v2072_v35 = vld [vmem:[%s4493_s6 + $0x268] sm:$0xff]  ;;  %v1737_v36 = vsub.s32 3, %v4363_v49  ;;  %v2089_v37 = vld [vmem:[%s4493_s6 + $0x2f0] sm:$0xff] }
 0x39b   :  { %3061 = vmatprep.subr.bf16.mxu1 %v3060_v39  ;;  %v2057_v39 = vld [vmem:[%s4493_s6 + $0x1f0] sm:$0xff] }
 0x39c   :  { %3119 = vmatpush3.bf16.msra.mxu0 %v3118_v38  ;;  %v3120_v41 = vpack.c.bf16 %v2058_v40, %v2057_v39  ;;  %v2090_v38 = vld [vmem:[%s4493_s6 + $0x2f8] sm:$0xff]  ;;  %v3150_v39 = vpack.c.bf16 %v2072_v35, %v2071_v34 }
 0x39d   :  { %1983 = vmatmul.mubr.f32.vlgmr.msra.gmra.mrb[20].mxu1 %v4038_v13  ;;  %v2018_v13 = vld [vmem:[%s4493_s6 + $0xb8] sm:$0xff] }
 0x39e   :  { %3063 = vmatpush3.bf16.msra.mxu1 %v3062_v44  ;;  %v3072_v57 = vpack.c.bf16 %v2018_v13, %v2017_v55  ;;  %v3122_v44 = vpack.c.bf16 %v2042_v43, %v2041_v42  ;;  %3121 = vmatprep.subr.bf16.mxu0 %v3120_v41  ;;  %v3152_v41 = vpack.c.bf16 %v2090_v38, %v2089_v37  ;;  %v2073_v42 = vld [vmem:[%s4493_s6 + $0x270] sm:$0xff]  ;;  %v2074_v43 = vld [vmem:[%s4493_s6 + $0x278] sm:$0xff] }
 0x39f   :  { %3065 = vmatprep.subr.bf16.mxu1 %v3064_v45  ;;  %v2075_v45 = vld [vmem:[%s4493_s6 + $0x280] sm:$0xff] }
 0x3a0   :  { %3123 = vmatpush3.bf16.msra.mxu0 %v3122_v44  ;;  %v3124_v47 = vpack.c.bf16 %v2076_v46, %v2075_v45  ;;  %v3154_v46 = vpack.c.bf16 %v2074_v43, %v2073_v42 }
 0x3a2   :  { %3067 = vmatpush3.bf16.msra.mxu1 %v3066_v50  ;;  %v1725_v50 = vsub.s32 0, %v4363_v49 }
 0x3a3   :  { %3069 = vmatprep.subr.bf16.mxu1 %v3068_v52  ;;  %v4369_v52 = vld [vmem:[%s4492_s5] sm:$0x3f] }
 0x3a4   :  { %v1726_v54 = vrot.slane %v4369_v52, %v1725_v50  ;;  %v1730_v55 = vrot.slane %v4369_v52, %v1729_v53  ;;  %v1734_v40 = vrot.slane %v4369_v52, %v1733_v32  ;;  %v1738_v44 = vrot.slane %v4369_v52, %v1737_v36 }
 0x3a6   :  { %3071 = vmatpush3.bf16.msra.mxu1 %v3070_v56 }
 0x3a7   :  { %3073 = vmatprep.subr.bf16.mxu1 %v3072_v57 }
 0x3aa   :  { %3075 = vmatpush3.bf16.msra.mxu1 %v3074_v63  ;;  %v2078_v63 = vld [vmem:[%s4493_s6 + $0x298] sm:$0xff] }
 0x3ab   :  { %3077 = vmatprep.subr.bf16.mxu1 %v3076_v0  ;;  %v3128_v4 = vpack.c.bf16 %v2078_v63, %v2077_v61 }
 0x3ae   :  { %3079 = vmatpush3.bf16.msra.mxu1 %v3078_v51  ;;  %v2062_v51 = vld [vmem:[%s4493_s6 + $0x218] sm:$0xff] }
 0x3af   :  { %3081 = vmatprep.subr.bf16.mxu1 %v3080_v1  ;;  %v2079_v1 = vld [vmem:[%s4493_s6 + $0x2a0] sm:$0xff]  ;;  %v3130_v6 = vpack.c.bf16 %v2062_v51, %v2061_v62 }
 0x3b0   :  { %v3132_v31 = vpack.c.bf16 %v2080_v5, %v2079_v1  ;;  %v2391_v62 = vld [vmem:[%s4494_s7] ss:$0 sm:$0xff] }
 0x3b2   :  { %3083 = vmatpush3.bf16.msra.mxu1 %v3082_v8  ;;  %v2064_v8 = vld [vmem:[%s4493_s6 + $0x228] sm:$0xff] }
 0x3b3   :  { %3085 = vmatprep.subr.bf16.mxu1 %v3084_v9  ;;  %v2081_v9 = vld [vmem:[%s4493_s6 + $0x2b0] sm:$0xff]  ;;  %v3134_v11 = vpack.c.bf16 %v2064_v8, %v2063_v7 }
 0x3b4   :  { %v3136_v12 = vpack.c.bf16 %v2082_v10, %v2081_v9 }
 0x3b6   :  { %3087 = vmatpush3.bf16.msra.mxu1 %v3086_v15  ;;  %v2066_v15 = vld [vmem:[%s4493_s6 + $0x238] sm:$0xff] }
 0x3b7   :  { %3089 = vmatprep.subr.bf16.mxu1 %v3088_v16  ;;  %v2083_v16 = vld [vmem:[%s4493_s6 + $0x2c0] sm:$0xff]  ;;  %v3138_v18 = vpack.c.bf16 %v2066_v15, %v2065_v14 }
 0x3b8   :  { %v3140_v19 = vpack.c.bf16 %v2084_v17, %v2083_v16 }
 0x3ba   :  { %3091 = vmatpush3.bf16.msra.mxu1 %v3090_v24  ;;  %v3142_v24 = vpack.c.bf16 %v2068_v21, %v2067_v20 }
 0x3bb   :  { %3125 = vmatprep.subr.bf16.mxu1 %v3124_v47 }
 0x430   :  { %v1842_v13 = vpop.f32.mrb[16].mxu1 }
 0x431   :  { %v1843_v56 = vadd.f32 %v1842_v13, %v1726_v54  ;;  %v1844_v57 = vpop.f32.mrb[17].mxu1  ;;  %v1745_v13 = vsub.s32 5, %v4363_v49 }
 0x432   :  { %v1845_v60 = vadd.f32 %v1844_v57, %v1730_v55  ;;  %v1741_v55 = vsub.s32 4, %v4363_v49 }
 0x433   :  { %v1989_v3 = vmax.f32 %v1843_v56, 0.0  ;;  %v1746_v57 = vrot.slane %v4369_v52, %v1745_v13 }
 0x434   :  { %v1990_v0 = vmax.f32 %v1845_v60, 0.0  ;;  %v1742_v56 = vrot.slane %v4369_v52, %v1741_v55 }
 0x436   :  { %2162 = vmatprep.mubr.f32.mxu1 %v1990_v0 }
 0x437   :  { %2163 = vmatmul.mubr.f32.vlgmr.msra.gmra.mrb[22].mxu1 %v1989_v3 }
 0x438   :  { %3127 = vmatpush3.bf16.msra.mxu1 %v3126_v2 }
 0x439   :  { %3129 = vmatprep.subr.bf16.mxu1 %v3128_v4 }
 0x43c   :  { %3131 = vmatpush3.bf16.msra.mxu1 %v3130_v6 }
 0x43d   :  { %3133 = vmatprep.subr.bf16.mxu1 %v3132_v31 }
 0x440   :  { %3135 = vmatpush3.bf16.msra.mxu1 %v3134_v11 }
 0x441   :  { %3137 = vmatprep.subr.bf16.mxu1 %v3136_v12 }
 0x444   :  { %3139 = vmatpush3.bf16.msra.mxu1 %v3138_v18 }
 0x445   :  { %3141 = vmatprep.subr.bf16.mxu1 %v3140_v19 }
 0x448   :  { %3143 = vmatpush3.bf16.msra.mxu1 %v3142_v24 }
 0x449   :  { %3145 = vmatprep.subr.bf16.mxu1 %v3144_v25 }
 0x44c   :  { %3147 = vmatpush3.bf16.msra.mxu1 %v3146_v30 }
 0x44d   :  { %3149 = vmatprep.subr.bf16.mxu1 %v3148_v33 }
 0x450   :  { %v1913_v45 = vpop.f32.mrb[18].mxu1  ;;  %3151 = vmatpush3.bf16.msra.mxu1 %v3150_v39 }
 0x451   :  { %v1914_v47 = vadd.f32 %v1913_v45, %v1734_v40  ;;  %v1915_v48 = vpop.f32.mrb[19].mxu1  ;;  %3153 = vmatprep.subr.bf16.mxu1 %v3152_v41 }
 0x452   :  { %v1916_v50 = vadd.f32 %v1915_v48, %v1738_v44 }
 0x453   :  { %v1991_v54 = vmax.f32 %v1914_v47, 0.0 }
 0x454   :  { %v1992_v53 = vmax.f32 %v1916_v50, 0.0  ;;  %3155 = vmatpush3.bf16.msra.mxu1 %v3154_v46 }
 0x456   :  { %2232 = vmatprep.mubr.f32.mxu0 %v1992_v53 }
 0x457   :  { %2233 = vmatmul.mubr.f32.vlgmr.msra.gmra.mrb[80].mxu0 %v1991_v54 }
 0x470   :  { %v1984_v58 = vpop.f32.mrb[20].mxu1 }
 0x471   :  { %v1985_v59 = vadd.f32 %v1984_v58, %v1742_v56  ;;  %v1986_v60 = vpop.f32.mrb[21].mxu1 }
 0x472   :  { %v1987_v61 = vadd.f32 %v1986_v60, %v1746_v57 }
 0x473   :  { %v1993_v0 = vmax.f32 %v1985_v59, 0.0 }
 0x474   :  { %v1994_v63 = vmax.f32 %v1987_v61, 0.0 }
 0x476   :  { %2302 = vmatprep.mubr.f32.mxu1 %v1994_v63 }
 0x477   :  { %2303 = vmatmul.mubr.f32.vlgmr.msra.gmra.mrb[24].mxu1 %v1993_v0 }
 0x50a   :  { %v2665_v2 = vpop.f32.mrb[22].mxu1 }
 0x50b   :  { %v2666_v3 = vpop.f32.mrb[23].mxu1 }
 0x50c   :  { %v2667_v4 = vadd.f32 %v2666_v3, %v2665_v2 }
 0x50e   :  { %v2165_v1 = vadd.f32 %v2667_v4, %v2391_v62 }
 0x52a   :  { %v2700_v49 = vpop.f32.mrb[80].mxu0 }
 0x52b   :  { %v2701_v51 = vpop.f32.mrb[81].mxu0 }
 0x52c   :  { %v2702_v5 = vadd.f32 %v2701_v51, %v2700_v49 }
 0x52e   :  { %v2235_v52 = vadd.f32 %v2702_v5, %v2165_v1 }
 0x54a   :  { %v2735_v6 = vpop.f32.mrb[24].mxu1 }
 0x54b   :  { %v2736_v31 = vpop.f32.mrb[25].mxu1 }
 0x54c   :  { %v2737_v7 = vadd.f32 %v2736_v31, %v2735_v6 }
 0x54e   :  { %v2305_v8 = vadd.f32 %v2737_v7, %v2235_v52 }
 0x550   :  { %2308 = vst [vmem:[#allocation8] sm:$0xff] %v2305_v8 }
 0x551   :  { %3240 = shalt.err (!%p3237_p0)
}
 0x552   :  { %s3241_s30 = scalar_lea.hbm %s4495_s8, 128 }
 0x553   :  { %p3242_p1 = scmp.ne.s32.totalorder %s4495_s8, %s3241_s30  ;;  %p3245_p2 = scmp.lt.u32.totalorder %s3241_s30, %s4495_s8 }
 0x555   :  { %p3247_p3 = pnand %p3245_p2, %p3242_p1 }
 0x557   :  { %3250 = shalt.err (!%p3247_p3)
}
 0x558   :  { %2318 = dma.vmem_to_hbm [thread:$0]  %s2316_s17, 128, %s4495_s8, [#allocation4]  }
 0x559   :  { %3255 = dma.done.wait [#allocation4], 128  }
 0x55a   :  { %3256 = vsyncadd [#allocation4], 4294967168 }
 0x55b   :  { %2322 = vsyncpa [#allocation3], 1 }
 0x55c   :  { %2323 = vsyncpa [#allocation6], 1 }
 0x55d   :  { %2324 = vsyncpa [#allocation4], 1 }

</bundles_post_ra>
